<compile_context>
chip_gen: v7x
topology: tpu7x:2x2x1
jax: 0.10.0
libtpu: 0.0.40
codegen_flags: <defaults>
</compile_context>

<pallas_src>
import functools

import jax
import jax.numpy as jnp
from jax.experimental import pallas as pl
from jax.experimental.pallas import tpu as pltpu

_LANE = 128


def _round_up(x, m):
    return ((x + m - 1) // m) * m


def _pad2d(x, rows, cols):
    r, c = x.shape
    return jnp.pad(x, ((0, rows - r), (0, cols - c)))


_VMEM_BUDGET_CACHE = [None]


def _vmem_budget():
    """Per-generation usable VMEM budget (bytes), with headroom."""
    if _VMEM_BUDGET_CACHE[0] is None:
        cap = 64 << 20  # conservative fallback (v7x physical)
        try:
            info = pltpu.get_tpu_info()
            cap = int(getattr(info, "vmem_capacity_bytes", cap))
        except Exception:
            pass
        # ~15% headroom for compiler-internal scratch; never request >110 MiB
        # (v5e/v6e: 128 MiB physical -> ~109 MiB; v7x: 64 MiB -> ~54 MiB).
        _VMEM_BUDGET_CACHE[0] = int(min(cap * 0.85, 110 << 20))
    return _VMEM_BUDGET_CACHE[0]


# ---------------------------------------------------------------------------
# Pallas kernels: one GraphConv layer, grid = (row tiles, reduction tiles)
# ---------------------------------------------------------------------------
def _agg_bias_kernel(a_ref, x_ref, b_ref, out_ref, acc_ref, *,
                     apply_relu, tk, rhs_resident):
    """out = act(A_hat @ X + b) where X = H @ W was precomputed outside."""
    k = pl.program_id(1)

    @pl.when(k == 0)
    def _init():
        acc_ref[...] = jnp.zeros_like(acc_ref)

    if rhs_resident:
        start = pl.multiple_of(k * tk, tk)
        x = x_ref[pl.ds(start, tk), :]
    else:
        x = x_ref[...]
    acc_ref[...] += jnp.dot(a_ref[...], x, preferred_element_type=jnp.float32)

    @pl.when(k == pl.num_programs(1) - 1)
    def _finalize():
        z = acc_ref[...] + b_ref[...]
        if apply_relu:
            z = jnp.maximum(z, 0.0)
        out_ref[...] = z.astype(out_ref.dtype)


def _agg_w_bias_kernel(a_ref, h_ref, w_ref, b_ref, out_ref, acc_ref, *,
                       apply_relu, tk, rhs_resident):
    """out = act((A_hat @ H) @ W + b): aggregate first, W in the epilogue."""
    k = pl.program_id(1)

    @pl.when(k == 0)
    def _init():
        acc_ref[...] = jnp.zeros_like(acc_ref)

    if rhs_resident:
        start = pl.multiple_of(k * tk, tk)
        h = h_ref[pl.ds(start, tk), :]
    else:
        h = h_ref[...]
    acc_ref[...] += jnp.dot(a_ref[...], h, preferred_element_type=jnp.float32)

    @pl.when(k == pl.num_programs(1) - 1)
    def _finalize():
        # bf16 operands for the epilogue matmul (f32xf32 would decompose into
        # multiple MXU passes, worst on v5e); f32 accumulate.
        z = jnp.dot(acc_ref[...].astype(jnp.bfloat16), w_ref[...],
                    preferred_element_type=jnp.float32) + b_ref[...]
        if apply_relu:
            z = jnp.maximum(z, 0.0)
        out_ref[...] = z.astype(out_ref.dtype)


# ---------------------------------------------------------------------------
# Per-layer pallas_call wrapper
# ---------------------------------------------------------------------------
def _graphconv_layer(a_pad, rhs, w_bf16, b_pad, *, tm, tk, apply_relu,
                     out_dtype, transform_first, rhs_resident, vmem_limit):
    n_pad = a_pad.shape[0]
    f_rhs = rhs.shape[1]
    f_out = b_pad.shape[1]
    grid = (n_pad // tm, n_pad // tk)

    if rhs_resident:
        rhs_spec = pl.BlockSpec((n_pad, f_rhs), lambda i, k: (0, 0))
    else:
        rhs_spec = pl.BlockSpec((tk, f_rhs), lambda i, k: (k, 0))

    in_specs = [pl.BlockSpec((tm, tk), lambda i, k: (i, k)), rhs_spec]
    args = [a_pad, rhs]
    if not transform_first:
        in_specs.append(pl.BlockSpec((f_rhs, f_out), lambda i, k: (0, 0)))
        args.append(w_bf16)
    in_specs.append(pl.BlockSpec((1, f_out), lambda i, k: (0, 0)))
    args.append(b_pad)

    kernel = functools.partial(
        _agg_bias_kernel if transform_first else _agg_w_bias_kernel,
        apply_relu=apply_relu, tk=tk, rhs_resident=rhs_resident)

    out_bytes = jnp.dtype(out_dtype).itemsize
    flops = 2 * n_pad * n_pad * f_rhs
    if not transform_first:
        flops += 2 * n_pad * f_rhs * f_out
    bytes_accessed = (
        n_pad * n_pad * 2
        + (n_pad * f_rhs * 2 if rhs_resident
           else (n_pad // tm) * n_pad * f_rhs * 2)
        + n_pad * f_out * out_bytes
        + (0 if transform_first else f_rhs * f_out * 2)
        + f_out * 4)

    return pl.pallas_call(
        kernel,
        out_shape=jax.ShapeDtypeStruct((n_pad, f_out), out_dtype),
        grid=grid,
        in_specs=in_specs,
        out_specs=pl.BlockSpec((tm, f_out), lambda i, k: (i, 0)),
        scratch_shapes=[pltpu.VMEM((tm, f_rhs), jnp.float32)],
        compiler_params=pltpu.CompilerParams(
            dimension_semantics=("parallel", "arbitrary"),
            vmem_limit_bytes=vmem_limit),
        cost_estimate=pl.CostEstimate(flops=flops, transcendentals=0,
                                      bytes_accessed=bytes_accessed),
    )(*args)


# ---------------------------------------------------------------------------
# Tiling / VMEM planning (Python-level, static shapes under jit)
# ---------------------------------------------------------------------------
def _plan_tiles(n, f_max, budget):
    n0 = _round_up(max(n, _LANE), _LANE)

    # Row tile: as big as possible (<=512) while keeping >=2 row tiles so
    # v7x's two TensorCores both get work via the "parallel" axis.
    tm = _LANE
    cap_m = min(512, n0 // 2 if n0 >= 2 * _LANE else n0)
    while tm * 2 <= cap_m:
        tm *= 2
    n_pad = _round_up(n0, tm)

    # Reduction tile: largest power-of-two multiple of 128 dividing n_pad,
    # capped at 2048 (A tile up to 2 MiB bf16, double buffered).
    tk = _LANE
    while tk * 2 <= 2048 and n_pad % (tk * 2) == 0:
        tk *= 2

    def need(tm_, tk_):  # worst-case (streamed RHS) VMEM use, f32 output
        return (2 * tm_ * tk_ * 2          # A tile bf16, double buffered
                + 2 * tk_ * f_max * 2      # RHS tile bf16, double buffered
                + 2 * f_max * f_max * 2    # W bf16 (agg-first path)
                + 2 * f_max * 4            # bias
                + 2 * tm_ * f_max * 4      # out tile, double buffered
                + tm_ * f_max * 4)         # f32 accumulator scratch

    while need(tm, tk) > budget and tk > _LANE:
        tk //= 2
    while need(tm, tk) > budget and tm > _LANE:
        tm //= 2
    n_pad = _round_up(n0, max(tm, tk))
    return tm, tk, n_pad


def _plan_layer_vmem(tm, tk, n_pad, f_rhs, f_out, out_bytes,
                     transform_first, budget):
    base = (2 * tm * tk * 2
            + (0 if transform_first else 2 * f_rhs * f_out * 2)
            + 2 * f_out * 4
            + 2 * tm * f_out * out_bytes
            + tm * f_rhs * 4)
    resident_rhs = 2 * n_pad * f_rhs * 2   # conservatively count 2 buffers
    streamed_rhs = 2 * tk * f_rhs * 2
    rhs_resident = base + resident_rhs <= budget
    need = base + (resident_rhs if rhs_resident else streamed_rhs)
    vmem_limit = int(min(max(need * 5 // 4 + (2 << 20), 16 << 20), budget))
    return rhs_resident, vmem_limit


# ---------------------------------------------------------------------------
# GCN module (plain-JAX glue around the Pallas per-layer kernel)
# ---------------------------------------------------------------------------
def init_gcn_params(key, num_layers, input_dim, hidden_dim, output_dim):
    params = []
    dims = []
    if num_layers == 1:
        dims.append((input_dim, output_dim))
    else:
        dims.append((input_dim, hidden_dim))
        for _ in range(num_layers - 2):
            dims.append((hidden_dim, hidden_dim))
        dims.append((hidden_dim, output_dim))
    for (fi, fo) in dims:
        key, kw = jax.random.split(key)
        scale = jnp.sqrt(6.0 / (fi + fo)).astype(jnp.float32)
        w = jax.random.uniform(kw, (fi, fo), jnp.float32, -scale, scale)
        b = jnp.zeros((fo,), jnp.float32)
        params.append((w, b))
    return params


def normalized_adjacency(adj):
    """A_hat = D_in^{-1/2} A D_out^{-1/2}; zero-degree norms clamped to 0."""
    adj = adj.astype(jnp.float32)
    deg_in = adj.sum(axis=1)
    deg_out = adj.sum(axis=0)
    norm_in = jnp.where(deg_in > 0, jax.lax.rsqrt(deg_in), 0.0)
    norm_out = jnp.where(deg_out > 0, jax.lax.rsqrt(deg_out), 0.0)
    return norm_in[:, None] * adj * norm_out[None, :]


def gcn_forward(adj_hat, feats, params, num_layers, norm_type="none"):
    """Mirrors GCN.forward: returns (h_list, h). Dropout = identity (eval)."""
    assert norm_type == "none"
    # TODO(synk): batch/layer norm variants (norm_type != 'none') not wired.
    # TODO(synk): for genuinely sparse graphs, a CSR scalar-prefetch SpMM
    #             formulation would replace the dense A_hat matmul.
    n, f_in0 = feats.shape
    num_layers = len(params)

    f_pads = [_round_up(max(f_in0, 1), _LANE)] + [
        _round_up(w.shape[1], _LANE) for (w, _) in params]
    f_max = max(f_pads)

    budget = _vmem_budget()
    tm, tk, n_pad = _plan_tiles(n, f_max, budget)

    a_pad = _pad2d(adj_hat.astype(jnp.float32), n_pad, n_pad).astype(jnp.bfloat16)
    h = _pad2d(feats.astype(jnp.float32), n_pad, f_pads[0])  # f32 first layer

    h_list = []
    h_out = None
    for l, (w, b) in enumerate(params):
        fi, fo = w.shape
        fi_pad = _round_up(fi, _LANE)
        fo_pad = _round_up(fo, _LANE)
        w_pad = _pad2d(w.astype(jnp.float32), fi_pad, fo_pad)
        b_pad = jnp.pad(b.astype(jnp.float32), (0, fo_pad - fo)).reshape(1, fo_pad)

        is_last = l == num_layers - 1
        apply_relu = (not is_last) or (num_layers == 1)
        out_dtype = jnp.float32 if is_last else jnp.bfloat16

        # Contraction order: run the O(N^2) aggregation at the narrower width.
        transform_first = fo_pad <= fi_pad
        if transform_first:
            # Precompute X = H @ W once (f32 accumulate), stream/resident bf16.
            rhs = jnp.dot(h.astype(jnp.float32), w_pad,
                          preferred_element_type=jnp.float32).astype(jnp.bfloat16)
            w_bf16 = None
        else:
            rhs = h.astype(jnp.bfloat16)
            w_bf16 = w_pad.astype(jnp.bfloat16)
        f_rhs = rhs.shape[1]

        rhs_resident, vmem_limit = _plan_layer_vmem(
            tm, tk, n_pad, f_rhs, fo_pad, jnp.dtype(out_dtype).itemsize,
            transform_first, budget)

        h = _graphconv_layer(a_pad, rhs, w_bf16, b_pad, tm=tm, tk=tk,
                             apply_relu=apply_relu, out_dtype=out_dtype,
                             transform_first=transform_first,
                             rhs_resident=rhs_resident, vmem_limit=vmem_limit)
        if not is_last:
            h_list.append(h[:n, :fo].astype(jnp.float32))
            # norm_type == 'none' -> no norm; dropout in eval mode is identity.
        else:
            h_out = h[:n, :fo]
    return h_list, h_out


gcn_forward_jit = jax.jit(gcn_forward, static_argnames=("num_layers", "norm_type"))


# ---------------------------------------------------------------------------
if __name__ == "__main__":
    num_layers = 3
    input_dim = 16
    hidden_dim = 200   # pads to 256 -> exercises both contraction orders
    output_dim = 8
    num_nodes = 160    # pads to 256 -> 2 row tiles (megacore-friendly)

    key = jax.random.PRNGKey(0)
    k_adj, k_feat, k_param = jax.random.split(key, 3)

    adj = (jax.random.uniform(k_adj, (num_nodes, num_nodes)) < 0.3).astype(
        jnp.float32)
    adj_hat = normalized_adjacency(adj)
    feats = jax.random.normal(k_feat, (num_nodes, input_dim), jnp.float32)
    params = init_gcn_params(k_param, num_layers, input_dim, hidden_dim,
                             output_dim)

    h_list, h = gcn_forward_jit(adj_hat, feats, params, num_layers=num_layers)
    h = jax.block_until_ready(h)
    for t in h_list:
        jax.block_until_ready(t)

    # Plain-JAX f32 reference (tolerance accounts for bf16 streaming operands).
    def ref_forward(a, x, ps):
        hl = []
        hh = x
        L = len(ps)
        for l, (w, b) in enumerate(ps):
            hh = a @ (hh @ w) + b
            if l != L - 1 or L == 1:
                hh = jnp.maximum(hh, 0.0)
            if l != L - 1:
                hl.append(hh)
        return hl, hh

    ref_list, ref_h = ref_forward(adj_hat, feats, params)

    assert h.shape == (num_nodes, output_dim)
    assert len(h_list) == num_layers - 1
    assert all(t.shape == (num_nodes, hidden_dim) for t in h_list)
    assert jnp.all(jnp.isfinite(h))

    def max_rel_err(got, ref):
        return float(jnp.max(jnp.abs(got - ref)) / (jnp.max(jnp.abs(ref)) + 1e-6))

    err_h = max_rel_err(h, ref_h)
    assert err_h < 0.05, err_h
    for got, ref in zip(h_list, ref_list):
        err = max_rel_err(got, ref)
        assert err < 0.05, err

    print("KERNEL_OK")
</pallas_src>

<mosaic_0001>
module attributes {stable_mosaic.version = 11 : i64} {
  func.func @_agg_w_bias_kernel(%arg0: i32, %arg1: i32, %arg2: memref<128x256xbf16, #tpu.memory_space<vmem>>, %arg3: memref<256x128xbf16, #tpu.memory_space<vmem>>, %arg4: memref<128x256xbf16, #tpu.memory_space<vmem>>, %arg5: memref<1x256xf32, #tpu.memory_space<vmem>>, %arg6: memref<128x256xbf16, #tpu.memory_space<vmem>>, %arg7: memref<128x128xf32, #tpu.memory_space<vmem>>) attributes {dimension_semantics = [#tpu.dimension_semantics<parallel>, #tpu.dimension_semantics<arbitrary>], iteration_bounds = array<i64: 2, 1>, scalar_prefetch = 0 : i64, scratch_operands = 1 : i64, tpu.core_type = #tpu.core_type<tc>, window_params = [{transform_indices = @transform_0, window_bounds = array<i64: 128, 256>}, {pipeline_mode = #tpu.pipeline_mode<synchronous>, transform_indices = @transform_1, window_bounds = array<i64: 256, 128>}, {pipeline_mode = #tpu.pipeline_mode<synchronous>, transform_indices = @transform_2, window_bounds = array<i64: 128, 256>}, {pipeline_mode = #tpu.pipeline_mode<synchronous>, transform_indices = @transform_3, window_bounds = array<i64: 1, 256>}, {transform_indices = @transform_4, window_bounds = array<i64: 128, 256>}]} {
    %c0_i32 = arith.constant 0 : i32
    %0 = arith.cmpi eq, %arg1, %c0_i32 : i32
    %1 = arith.extui %0 : i1 to i32
    %c0_i32_0 = arith.constant 0 : i32
    %2 = arith.cmpi ne, %1, %c0_i32_0 : i32
    scf.if %2 {
      %cst_9 = arith.constant 0.000000e+00 : f32
      %15 = vector.broadcast %cst_9 : f32 to vector<128x128xf32>
      %c0_10 = arith.constant 0 : index
      %c0_11 = arith.constant 0 : index
      %16 = vector.load %arg7[%c0_10, %c0_11] : memref<128x128xf32, #tpu.memory_space<vmem>>, vector<128x128xf32>
      tpu.vector_store %arg7[%c0_10, %c0_11], %15 {strides = array<i32>} : memref<128x128xf32, #tpu.memory_space<vmem>>, vector<128x128xf32>,
    } else {
    }
    %c256_i32 = arith.constant 256 : i32
    %3 = arith.muli %arg1, %c256_i32 : i32
    %4 = tpu.assume_multiple %3, 256 : i32
    %5 = arith.index_cast %4 : i32 to index
    %c0 = arith.constant 0 : index
    %6 = vector.load %arg3[%5, %c0] : memref<256x128xbf16, #tpu.memory_space<vmem>>, vector<256x128xbf16>
    %c0_1 = arith.constant 0 : index
    %c0_2 = arith.constant 0 : index
    %7 = vector.load %arg7[%c0_1, %c0_2] : memref<128x128xf32, #tpu.memory_space<vmem>>, vector<128x128xf32>
    %c0_3 = arith.constant 0 : index
    %c0_4 = arith.constant 0 : index
    %8 = vector.load %arg2[%c0_3, %c0_4] : memref<128x256xbf16, #tpu.memory_space<vmem>>, vector<128x256xbf16>
    %cst = arith.constant dense<0.000000e+00> : vector<128x128xf32>
    %9 = tpu.matmul %8, %6, %cst {dimension_numbers = #tpu.dot_dimension_numbers<[1], [0], [0], [1], [0, 0, 1, 1], [], []>} : vector<128x256xbf16>, vector<256x128xbf16>, vector<128x128xf32> -> vector<128x128xf32>
    %10 = arith.addf %7, %9 : vector<128x128xf32>
    %c0_5 = arith.constant 0 : index
    %c0_6 = arith.constant 0 : index
    %11 = vector.load %arg7[%c0_5, %c0_6] : memref<128x128xf32, #tpu.memory_space<vmem>>, vector<128x128xf32>
    tpu.vector_store %arg7[%c0_5, %c0_6], %10 {strides = array<i32>} : memref<128x128xf32, #tpu.memory_space<vmem>>, vector<128x128xf32>,
    %c0_i32_7 = arith.constant 0 : i32
    %12 = arith.cmpi eq, %arg1, %c0_i32_7 : i32
    %13 = arith.extui %12 : i1 to i32
    %c0_i32_8 = arith.constant 0 : i32
    %14 = arith.cmpi ne, %13, %c0_i32_8 : i32
    scf.if %14 {
      %c0_9 = arith.constant 0 : index
      %c0_10 = arith.constant 0 : index
      %15 = vector.load %arg7[%c0_9, %c0_10] : memref<128x128xf32, #tpu.memory_space<vmem>>, vector<128x128xf32>
      %16 = arith.truncf %15 : vector<128x128xf32> to vector<128x128xbf16>
      %c0_11 = arith.constant 0 : index
      %c0_12 = arith.constant 0 : index
      %17 = vector.load %arg4[%c0_11, %c0_12] : memref<128x256xbf16, #tpu.memory_space<vmem>>, vector<128x256xbf16>
      %cst_13 = arith.constant dense<0.000000e+00> : vector<128x256xf32>
      %18 = tpu.matmul %16, %17, %cst_13 {dimension_numbers = #tpu.dot_dimension_numbers<[1], [0], [0], [1], [0, 0, 1, 1], [], []>} : vector<128x128xbf16>, vector<128x256xbf16>, vector<128x256xf32> -> vector<128x256xf32>
      %c0_14 = arith.constant 0 : index
      %c0_15 = arith.constant 0 : index
      %19 = vector.load %arg5[%c0_14, %c0_15] : memref<1x256xf32, #tpu.memory_space<vmem>>, vector<1x256xf32>
      %20 = vector.broadcast %19 : vector<1x256xf32> to vector<128x256xf32>
      %21 = arith.addf %18, %20 : vector<128x256xf32>
      %cst_16 = arith.constant 0.000000e+00 : f32
      %22 = vector.broadcast %cst_16 : f32 to vector<128x256xf32>
      %23 = arith.maximumf %21, %22 : vector<128x256xf32>
      %24 = arith.truncf %23 : vector<128x256xf32> to vector<128x256xbf16>
      %c0_17 = arith.constant 0 : index
      %c0_18 = arith.constant 0 : index
      %25 = vector.load %arg6[%c0_17, %c0_18] : memref<128x256xbf16, #tpu.memory_space<vmem>>, vector<128x256xbf16>
      tpu.vector_store %arg6[%c0_17, %c0_18], %24 {strides = array<i32>} : memref<128x256xbf16, #tpu.memory_space<vmem>>, vector<128x256xbf16>,
    } else {
    }
    return
  }
  func.func @transform_0(%arg0: i32, %arg1: i32) -> (i32, i32) {
    %c0_i32 = arith.constant 0 : i32
    return %arg0, %arg1 : i32, i32
  }
  func.func @transform_1(%arg0: i32, %arg1: i32) -> (i32, i32) {
    %c0_i32 = arith.constant 0 : i32
    %c0_i32_0 = arith.constant 0 : i32
    %c0_i32_1 = arith.constant 0 : i32
    return %c0_i32, %c0_i32_0 : i32, i32
  }
  func.func @transform_2(%arg0: i32, %arg1: i32) -> (i32, i32) {
    %c0_i32 = arith.constant 0 : i32
    %c0_i32_0 = arith.constant 0 : i32
    %c0_i32_1 = arith.constant 0 : i32
    return %c0_i32, %c0_i32_0 : i32, i32
  }
  func.func @transform_3(%arg0: i32, %arg1: i32) -> (i32, i32) {
    %c0_i32 = arith.constant 0 : i32
    %c0_i32_0 = arith.constant 0 : i32
    %c0_i32_1 = arith.constant 0 : i32
    return %c0_i32, %c0_i32_0 : i32, i32
  }
  func.func @transform_4(%arg0: i32, %arg1: i32) -> (i32, i32) {
    %c0_i32 = arith.constant 0 : i32
    %c0_i32_0 = arith.constant 0 : i32
    return %arg0, %c0_i32 : i32, i32
  }
}

module attributes {stable_mosaic.version = 11 : i64} {
  func.func @_agg_bias_kernel(%arg0: i32, %arg1: i32, %arg2: memref<128x256xbf16, #tpu.memory_space<vmem>>, %arg3: memref<256x256xbf16, #tpu.memory_space<vmem>>, %arg4: memref<1x256xf32, #tpu.memory_space<vmem>>, %arg5: memref<128x256xbf16, #tpu.memory_space<vmem>>, %arg6: memref<128x256xf32, #tpu.memory_space<vmem>>) attributes {dimension_semantics = [#tpu.dimension_semantics<parallel>, #tpu.dimension_semantics<arbitrary>], iteration_bounds = array<i64: 2, 1>, scalar_prefetch = 0 : i64, scratch_operands = 1 : i64, tpu.core_type = #tpu.core_type<tc>, window_params = [{transform_indices = @transform_0, window_bounds = array<i64: 128, 256>}, {pipeline_mode = #tpu.pipeline_mode<synchronous>, transform_indices = @transform_1, window_bounds = array<i64: 256, 256>}, {pipeline_mode = #tpu.pipeline_mode<synchronous>, transform_indices = @transform_2, window_bounds = array<i64: 1, 256>}, {transform_indices = @transform_3, window_bounds = array<i64: 128, 256>}]} {
    %c0_i32 = arith.constant 0 : i32
    %0 = arith.cmpi eq, %arg1, %c0_i32 : i32
    %1 = arith.extui %0 : i1 to i32
    %c0_i32_0 = arith.constant 0 : i32
    %2 = arith.cmpi ne, %1, %c0_i32_0 : i32
    scf.if %2 {
      %cst_9 = arith.constant 0.000000e+00 : f32
      %15 = vector.broadcast %cst_9 : f32 to vector<128x256xf32>
      %c0_10 = arith.constant 0 : index
      %c0_11 = arith.constant 0 : index
      %16 = vector.load %arg6[%c0_10, %c0_11] : memref<128x256xf32, #tpu.memory_space<vmem>>, vector<128x256xf32>
      tpu.vector_store %arg6[%c0_10, %c0_11], %15 {strides = array<i32>} : memref<128x256xf32, #tpu.memory_space<vmem>>, vector<128x256xf32>,
    } else {
    }
    %c256_i32 = arith.constant 256 : i32
    %3 = arith.muli %arg1, %c256_i32 : i32
    %4 = tpu.assume_multiple %3, 256 : i32
    %5 = arith.index_cast %4 : i32 to index
    %c0 = arith.constant 0 : index
    %6 = vector.load %arg3[%5, %c0] : memref<256x256xbf16, #tpu.memory_space<vmem>>, vector<256x256xbf16>
    %c0_1 = arith.constant 0 : index
    %c0_2 = arith.constant 0 : index
    %7 = vector.load %arg6[%c0_1, %c0_2] : memref<128x256xf32, #tpu.memory_space<vmem>>, vector<128x256xf32>
    %c0_3 = arith.constant 0 : index
    %c0_4 = arith.constant 0 : index
    %8 = vector.load %arg2[%c0_3, %c0_4] : memref<128x256xbf16, #tpu.memory_space<vmem>>, vector<128x256xbf16>
    %cst = arith.constant dense<0.000000e+00> : vector<128x256xf32>
    %9 = tpu.matmul %8, %6, %cst {dimension_numbers = #tpu.dot_dimension_numbers<[1], [0], [0], [1], [0, 0, 1, 1], [], []>} : vector<128x256xbf16>, vector<256x256xbf16>, vector<128x256xf32> -> vector<128x256xf32>
    %10 = arith.addf %7, %9 : vector<128x256xf32>
    %c0_5 = arith.constant 0 : index
    %c0_6 = arith.constant 0 : index
    %11 = vector.load %arg6[%c0_5, %c0_6] : memref<128x256xf32, #tpu.memory_space<vmem>>, vector<128x256xf32>
    tpu.vector_store %arg6[%c0_5, %c0_6], %10 {strides = array<i32>} : memref<128x256xf32, #tpu.memory_space<vmem>>, vector<128x256xf32>,
    %c0_i32_7 = arith.constant 0 : i32
    %12 = arith.cmpi eq, %arg1, %c0_i32_7 : i32
    %13 = arith.extui %12 : i1 to i32
    %c0_i32_8 = arith.constant 0 : i32
    %14 = arith.cmpi ne, %13, %c0_i32_8 : i32
    scf.if %14 {
      %c0_9 = arith.constant 0 : index
      %c0_10 = arith.constant 0 : index
      %15 = vector.load %arg6[%c0_9, %c0_10] : memref<128x256xf32, #tpu.memory_space<vmem>>, vector<128x256xf32>
      %c0_11 = arith.constant 0 : index
      %c0_12 = arith.constant 0 : index
      %16 = vector.load %arg4[%c0_11, %c0_12] : memref<1x256xf32, #tpu.memory_space<vmem>>, vector<1x256xf32>
      %17 = vector.broadcast %16 : vector<1x256xf32> to vector<128x256xf32>
      %18 = arith.addf %15, %17 : vector<128x256xf32>
      %cst_13 = arith.constant 0.000000e+00 : f32
      %19 = vector.broadcast %cst_13 : f32 to vector<128x256xf32>
      %20 = arith.maximumf %18, %19 : vector<128x256xf32>
      %21 = arith.truncf %20 : vector<128x256xf32> to vector<128x256xbf16>
      %c0_14 = arith.constant 0 : index
      %c0_15 = arith.constant 0 : index
      %22 = vector.load %arg5[%c0_14, %c0_15] : memref<128x256xbf16, #tpu.memory_space<vmem>>, vector<128x256xbf16>
      tpu.vector_store %arg5[%c0_14, %c0_15], %21 {strides = array<i32>} : memref<128x256xbf16, #tpu.memory_space<vmem>>, vector<128x256xbf16>,
    } else {
    }
    return
  }
  func.func @transform_0(%arg0: i32, %arg1: i32) -> (i32, i32) {
    %c0_i32 = arith.constant 0 : i32
    return %arg0, %arg1 : i32, i32
  }
  func.func @transform_1(%arg0: i32, %arg1: i32) -> (i32, i32) {
    %c0_i32 = arith.constant 0 : i32
    %c0_i32_0 = arith.constant 0 : i32
    %c0_i32_1 = arith.constant 0 : i32
    return %c0_i32, %c0_i32_0 : i32, i32
  }
  func.func @transform_2(%arg0: i32, %arg1: i32) -> (i32, i32) {
    %c0_i32 = arith.constant 0 : i32
    %c0_i32_0 = arith.constant 0 : i32
    %c0_i32_1 = arith.constant 0 : i32
    return %c0_i32, %c0_i32_0 : i32, i32
  }
  func.func @transform_3(%arg0: i32, %arg1: i32) -> (i32, i32) {
    %c0_i32 = arith.constant 0 : i32
    %c0_i32_0 = arith.constant 0 : i32
    return %arg0, %c0_i32 : i32, i32
  }
}

module attributes {stable_mosaic.version = 11 : i64} {
  func.func @_agg_bias_kernel(%arg0: i32, %arg1: i32, %arg2: memref<128x256xbf16, #tpu.memory_space<vmem>>, %arg3: memref<256x128xbf16, #tpu.memory_space<vmem>>, %arg4: memref<1x128xf32, #tpu.memory_space<vmem>>, %arg5: memref<128x128xf32, #tpu.memory_space<vmem>>, %arg6: memref<128x128xf32, #tpu.memory_space<vmem>>) attributes {dimension_semantics = [#tpu.dimension_semantics<parallel>, #tpu.dimension_semantics<arbitrary>], iteration_bounds = array<i64: 2, 1>, scalar_prefetch = 0 : i64, scratch_operands = 1 : i64, tpu.core_type = #tpu.core_type<tc>, window_params = [{transform_indices = @transform_0, window_bounds = array<i64: 128, 256>}, {pipeline_mode = #tpu.pipeline_mode<synchronous>, transform_indices = @transform_1, window_bounds = array<i64: 256, 128>}, {pipeline_mode = #tpu.pipeline_mode<synchronous>, transform_indices = @transform_2, window_bounds = array<i64: 1, 128>}, {transform_indices = @transform_3, window_bounds = array<i64: 128, 128>}]} {
    %c0_i32 = arith.constant 0 : i32
    %0 = arith.cmpi eq, %arg1, %c0_i32 : i32
    %1 = arith.extui %0 : i1 to i32
    %c0_i32_0 = arith.constant 0 : i32
    %2 = arith.cmpi ne, %1, %c0_i32_0 : i32
    scf.if %2 {
      %cst_9 = arith.constant 0.000000e+00 : f32
      %15 = vector.broadcast %cst_9 : f32 to vector<128x128xf32>
      %c0_10 = arith.constant 0 : index
      %c0_11 = arith.constant 0 : index
      %16 = vector.load %arg6[%c0_10, %c0_11] : memref<128x128xf32, #tpu.memory_space<vmem>>, vector<128x128xf32>
      tpu.vector_store %arg6[%c0_10, %c0_11], %15 {strides = array<i32>} : memref<128x128xf32, #tpu.memory_space<vmem>>, vector<128x128xf32>,
    } else {
    }
    %c256_i32 = arith.constant 256 : i32
    %3 = arith.muli %arg1, %c256_i32 : i32
    %4 = tpu.assume_multiple %3, 256 : i32
    %5 = arith.index_cast %4 : i32 to index
    %c0 = arith.constant 0 : index
    %6 = vector.load %arg3[%5, %c0] : memref<256x128xbf16, #tpu.memory_space<vmem>>, vector<256x128xbf16>
    %c0_1 = arith.constant 0 : index
    %c0_2 = arith.constant 0 : index
    %7 = vector.load %arg6[%c0_1, %c0_2] : memref<128x128xf32, #tpu.memory_space<vmem>>, vector<128x128xf32>
    %c0_3 = arith.constant 0 : index
    %c0_4 = arith.constant 0 : index
    %8 = vector.load %arg2[%c0_3, %c0_4] : memref<128x256xbf16, #tpu.memory_space<vmem>>, vector<128x256xbf16>
    %cst = arith.constant dense<0.000000e+00> : vector<128x128xf32>
    %9 = tpu.matmul %8, %6, %cst {dimension_numbers = #tpu.dot_dimension_numbers<[1], [0], [0], [1], [0, 0, 1, 1], [], []>} : vector<128x256xbf16>, vector<256x128xbf16>, vector<128x128xf32> -> vector<128x128xf32>
    %10 = arith.addf %7, %9 : vector<128x128xf32>
    %c0_5 = arith.constant 0 : index
    %c0_6 = arith.constant 0 : index
    %11 = vector.load %arg6[%c0_5, %c0_6] : memref<128x128xf32, #tpu.memory_space<vmem>>, vector<128x128xf32>
    tpu.vector_store %arg6[%c0_5, %c0_6], %10 {strides = array<i32>} : memref<128x128xf32, #tpu.memory_space<vmem>>, vector<128x128xf32>,
    %c0_i32_7 = arith.constant 0 : i32
    %12 = arith.cmpi eq, %arg1, %c0_i32_7 : i32
    %13 = arith.extui %12 : i1 to i32
    %c0_i32_8 = arith.constant 0 : i32
    %14 = arith.cmpi ne, %13, %c0_i32_8 : i32
    scf.if %14 {
      %c0_9 = arith.constant 0 : index
      %c0_10 = arith.constant 0 : index
      %15 = vector.load %arg6[%c0_9, %c0_10] : memref<128x128xf32, #tpu.memory_space<vmem>>, vector<128x128xf32>
      %c0_11 = arith.constant 0 : index
      %c0_12 = arith.constant 0 : index
      %16 = vector.load %arg4[%c0_11, %c0_12] : memref<1x128xf32, #tpu.memory_space<vmem>>, vector<1x128xf32>
      %17 = vector.broadcast %16 : vector<1x128xf32> to vector<128x128xf32>
      %18 = arith.addf %15, %17 : vector<128x128xf32>
      %c0_13 = arith.constant 0 : index
      %c0_14 = arith.constant 0 : index
      %19 = vector.load %arg5[%c0_13, %c0_14] : memref<128x128xf32, #tpu.memory_space<vmem>>, vector<128x128xf32>
      tpu.vector_store %arg5[%c0_13, %c0_14], %18 {strides = array<i32>} : memref<128x128xf32, #tpu.memory_space<vmem>>, vector<128x128xf32>,
    } else {
    }
    return
  }
  func.func @transform_0(%arg0: i32, %arg1: i32) -> (i32, i32) {
    %c0_i32 = arith.constant 0 : i32
    return %arg0, %arg1 : i32, i32
  }
  func.func @transform_1(%arg0: i32, %arg1: i32) -> (i32, i32) {
    %c0_i32 = arith.constant 0 : i32
    %c0_i32_0 = arith.constant 0 : i32
    %c0_i32_1 = arith.constant 0 : i32
    return %c0_i32, %c0_i32_0 : i32, i32
  }
  func.func @transform_2(%arg0: i32, %arg1: i32) -> (i32, i32) {
    %c0_i32 = arith.constant 0 : i32
    %c0_i32_0 = arith.constant 0 : i32
    %c0_i32_1 = arith.constant 0 : i32
    return %c0_i32, %c0_i32_0 : i32, i32
  }
  func.func @transform_3(%arg0: i32, %arg1: i32) -> (i32, i32) {
    %c0_i32 = arith.constant 0 : i32
    %c0_i32_0 = arith.constant 0 : i32
    return %arg0, %c0_i32 : i32, i32
  }
}

</mosaic_0001>

<bundles_post_ra>
// kernel: gcn_forward.5
= control target key start
LH: loop header
LB: loop body
LE: loop exit
PB: predicated region body
PF: predicated region fallthrough
CT: control target
= control target key end

     0   :  { %s965_s12 = smov 0   ;;  %s967_s13 = smov 0   ;;  %s1110_s0 = inlined_call_operand.vmem [shape: bf16[256,256], index: 0, kind: input, shape index: {}]   ;;  %s1111_s1 = inlined_call_operand.vmem [shape: bf16[256,128], index: 1, kind: input, shape index: {}]   ;;  %s1112_s2 = inlined_call_operand.vmem [shape: f32[1,128], index: 2, kind: input, shape index: {}]   ;;  %s1113_s3 = inlined_call_operand.vmem [shape: f32[256,128], index: 3, kind: output, shape index: {}]  }
   0x1   :  { %s969_s14 = smov 0  }
   0x2 LB: > { %s25_s15 = sadd.s32 1, %s939_s13  ;;  %p735_p0 = scmp.ge.s32.totalorder %s943_s14, 1  ;;  %s943_s14 = sphi %s969_s14, %s13_s14   ;;  %s939_s13 = sphi %s967_s13, %s1115_s13   ;;  %s935_s12 = sphi %s965_s12, %s1114_s12  }
   0x3   : > { %p27_p1 = scmp.ge.s32.totalorder %s25_s15, 2  ;;  %p158_p2 = scmp.lt.s32.totalorder %s943_s14, 3 }
   0x5   : > { %s1117_s15 = smov (%p27_p1, %s25_s15), 0  ;;  %p159_p3 = pnand %p735_p0, %p158_p2 }
   0x6   : > { %v881_v0 = vld [vmem:[%s1111_s1 + $0x40] sm:$0xff] (!%p159_p3)   ;;  %s736_s18 = sshll.u32 (!%p159_p3), %s935_s12, 4  ;;  %v883_v2 = vld [vmem:[%s1111_s1 + $0x48] sm:$0xff] (!%p159_p3)   ;;  %v885_v4 = vld [vmem:[%s1111_s1 + $0x50] sm:$0xff] (!%p159_p3)  }
   0x7   : > { %162 = sbr.rel (%p159_p3) target bundleno = 283 (0x11b), region = 32  ;;  %v882_v1 = vld [vmem:[%s1111_s1] sm:$0xff] (!%p159_p3)   ;;  %777 = vmatprep.subr.bf16.mxu0 (!%p159_p3), %v881_v0  ;;  %841 = vmatprep.subr.bf16.mxu1 (!%p159_p3), %v881_v0  ;;  %v884_v3 = vld [vmem:[%s1111_s1 + $0x8] sm:$0xff] (!%p159_p3)   ;;  %p189_p4 = scmp.lt.s32.totalorder (!%p159_p3), %s736_s18, 31  ;;  %v886_v5 = vld [vmem:[%s1111_s1 + $0x10] sm:$0xff] (!%p159_p3)  }
   0x8   : > { %778 = vmatpush3.bf16.msra.mxu0 (!%p159_p3), %v882_v1  ;;  %849 = vmatpush3.bf16.msra.mxu1 (!%p159_p3), %v882_v1  ;;  %v887_v6 = vld [vmem:[%s1111_s1 + $0x58] sm:$0xff] (!%p159_p3)   ;;  %v889_v8 = vld [vmem:[%s1111_s1 + $0x60] sm:$0xff] (!%p159_p3)   ;;  %v891_v10 = vld [vmem:[%s1111_s1 + $0x68] sm:$0xff] (!%p159_p3)  }
   0x9   : > { %779 = vmatprep.subr.bf16.mxu0 (!%p159_p3), %v883_v2  ;;  %842 = vmatprep.subr.bf16.mxu1 (!%p159_p3), %v883_v2  ;;  %v888_v7 = vld [vmem:[%s1111_s1 + $0x18] sm:$0xff] (!%p159_p3)   ;;  %v890_v9 = vld [vmem:[%s1111_s1 + $0x20] sm:$0xff] (!%p159_p3)   ;;  %v892_v13 = vld [vmem:[%s1111_s1 + $0x28] sm:$0xff] (!%p159_p3)  }
   0xa   : > { %v893_v14 = vld [vmem:[%s1111_s1 + $0x70] sm:$0xff] (!%p159_p3)   ;;  %v895_v16 = vld [vmem:[%s1111_s1 + $0x78] sm:$0xff] (!%p159_p3)   ;;  %v1060_v35 = vld [vmem:[%s1112_s2] ss:$0 sm:$0xff] (!%p159_p3) }
   0xb   : > { %v894_v15 = vld [vmem:[%s1111_s1 + $0x30] sm:$0xff] (!%p159_p3)   ;;  %v896_v17 = vld [vmem:[%s1111_s1 + $0x38] sm:$0xff] (!%p159_p3)  }
   0xc   : > { %780 = vmatpush3.bf16.msra.mxu0 (!%p159_p3), %v884_v3  ;;  %850 = vmatpush3.bf16.msra.mxu1 (!%p159_p3), %v884_v3 }
   0xd   : > { %781 = vmatprep.subr.bf16.mxu0 (!%p159_p3), %v885_v4  ;;  %843 = vmatprep.subr.bf16.mxu1 (!%p159_p3), %v885_v4 }
   0xe   : > { %s1119_s18 = smov (!%p189_p4, %s736_s18), 31 }
   0xf   : > { %s776_s6 = sshll.u32 %s1119_s18, 3 }
  0x10   : > { %782 = vmatpush3.bf16.msra.mxu0 %v886_v5  ;;  %851 = vmatpush3.bf16.msra.mxu1 %v886_v5  ;;  %s1018_s11 = scalar_lea.vmem %s1110_s0, %s776_s6  ;;  %s1067_s8 = scalar_lea.vmem %s1113_s3, %s776_s6 }
  0x11   : > { %783 = vmatprep.subr.bf16.mxu0 %v887_v6  ;;  %844 = vmatprep.subr.bf16.mxu1 %v887_v6  ;;  %v899_v11 = vld [vmem:[%s1018_s11 + $0x4] ss:$8 sps:$4 sm:$0xff]   ;;  %v897_v18 = vld [vmem:[%s1018_s11] ss:$8 sps:$4 sm:$0xff]   ;;  %v903_v20 = vld [vmem:[%s1018_s11 + $0x14] ss:$8 sps:$4 sm:$0xff]  }
  0x12   : > { %v902_v12 = vld [vmem:[%s1018_s11 + $0x44] ss:$8 sps:$4 sm:$0xff]   ;;  %503 = vmatprep.mubr.bf16.mxu0 %v899_v11  ;;  %v900_v19 = vld [vmem:[%s1018_s11 + $0x40] ss:$8 sps:$4 sm:$0xff]   ;;  %v905_v21 = vld [vmem:[%s1018_s11 + $0x54] ss:$8 sps:$4 sm:$0xff]  }
  0x13   : > { %535 = vmatprep.mubr.bf16.mxu1 %v902_v12  ;;  %v907_v22 = vld [vmem:[%s1018_s11 + $0x10] ss:$8 sps:$4 sm:$0xff]   ;;  %v909_v24 = vld [vmem:[%s1018_s11 + $0x24] ss:$8 sps:$4 sm:$0xff]   ;;  %v913_v26 = vld [vmem:[%s1018_s11 + $0x20] ss:$8 sps:$4 sm:$0xff]  }
  0x14   : > { %784 = vmatpush3.bf16.msra.mxu0 %v888_v7  ;;  %852 = vmatpush3.bf16.msra.mxu1 %v888_v7  ;;  %v908_v23 = vld [vmem:[%s1018_s11 + $0x50] ss:$8 sps:$4 sm:$0xff]   ;;  %v911_v25 = vld [vmem:[%s1018_s11 + $0x64] ss:$8 sps:$4 sm:$0xff]   ;;  %v914_v27 = vld [vmem:[%s1018_s11 + $0x60] ss:$8 sps:$4 sm:$0xff]  }
  0x15   : > { %785 = vmatprep.subr.bf16.mxu0 %v889_v8  ;;  %845 = vmatprep.subr.bf16.mxu1 %v889_v8  ;;  %v915_v28 = vld [vmem:[%s1018_s11 + $0x34] ss:$8 sps:$4 sm:$0xff]   ;;  %v919_v30 = vld [vmem:[%s1018_s11 + $0x30] ss:$8 sps:$4 sm:$0xff]  }
  0x16   : > { %v917_v29 = vld [vmem:[%s1018_s11 + $0x74] ss:$8 sps:$4 sm:$0xff]   ;;  %v920_v31 = vld [vmem:[%s1018_s11 + $0x70] ss:$8 sps:$4 sm:$0xff]  }
  0x18   : > { %786 = vmatpush3.bf16.msra.mxu0 %v890_v9  ;;  %853 = vmatpush3.bf16.msra.mxu1 %v890_v9 }
  0x19   : > { %787 = vmatprep.subr.bf16.mxu0 %v891_v10  ;;  %846 = vmatprep.subr.bf16.mxu1 %v891_v10 }
  0x1c   : > { %788 = vmatpush3.bf16.msra.mxu0 %v892_v13  ;;  %854 = vmatpush3.bf16.msra.mxu1 %v892_v13 }
  0x1d   : > { %789 = vmatprep.subr.bf16.mxu0 %v893_v14  ;;  %847 = vmatprep.subr.bf16.mxu1 %v893_v14 }
  0x20   : > { %790 = vmatpush3.bf16.msra.mxu0 %v894_v15  ;;  %855 = vmatpush3.bf16.msra.mxu1 %v894_v15 }
  0x21   : > { %791 = vmatprep.subr.bf16.mxu0 %v895_v16  ;;  %848 = vmatprep.subr.bf16.mxu1 %v895_v16 }
  0x24   : > { %792 = vmatpush3.bf16.msra.mxu0 %v896_v17  ;;  %856 = vmatpush3.bf16.msra.mxu1 %v896_v17 }
  0x27   : > { %504 = vmatmul.mubr.bf16.vlgmr.msra.gmra.mrb[0].mxu0 %v897_v18  ;;  %536 = vmatmul.mubr.bf16.vlgmr.msra.gmra.mrb[0].mxu1 %v900_v19 }
  0x28   : > { %511 = vmatprep.mubr.bf16.mxu0 %v903_v20  ;;  %543 = vmatprep.mubr.bf16.mxu1 %v905_v21 }
  0x2f   : > { %512 = vmatmul.mubr.bf16.gmra.mrb[4].mxu0 %v907_v22  ;;  %544 = vmatmul.mubr.bf16.gmra.mrb[4].mxu1 %v908_v23 }
  0x30   : > { %519 = vmatprep.mubr.bf16.mxu0 %v909_v24  ;;  %551 = vmatprep.mubr.bf16.mxu1 %v911_v25 }
  0x37   : > { %520 = vmatmul.mubr.bf16.gmra.mrb[8].mxu0 %v913_v26  ;;  %552 = vmatmul.mubr.bf16.gmra.mrb[8].mxu1 %v914_v27 }
  0x38   : > { %527 = vmatprep.mubr.bf16.mxu0 %v915_v28  ;;  %559 = vmatprep.mubr.bf16.mxu1 %v917_v29 }
  0x3f   : > { %528 = vmatmul.mubr.bf16.gmra.mrb[12].mxu0 %v919_v30  ;;  %560 = vmatmul.mubr.bf16.gmra.mrb[12].mxu1 %v920_v31 }
  0xfa   : > { %v793_v32 = vpop.f32.mrb[0].mxu0  ;;  %v817_v33 = vpop.f32.mrb[0].mxu1 }
  0xfb   : > { %v794_v34 = vpop.f32.mrb[1].mxu0  ;;  %v818_v36 = vpop.f32.mrb[1].mxu1 }
  0xfc   : > { %v795_v37 = vadd.f32 %v794_v34, %v793_v32  ;;  %v819_v38 = vadd.f32 %v818_v36, %v817_v33  ;;  %v796_v39 = vpop.f32.mrb[2].mxu0  ;;  %v820_v40 = vpop.f32.mrb[2].mxu1 }
  0xfd   : > { %v797_v41 = vpop.f32.mrb[3].mxu0  ;;  %v821_v42 = vpop.f32.mrb[3].mxu1 }
  0xfe   : > { %v626_v43 = vadd.f32 %v795_v37, %v1060_v35  ;;  %v634_v44 = vadd.f32 %v819_v38, %v1060_v35  ;;  %v798_v45 = vadd.f32 %v797_v41, %v796_v39  ;;  %v822_v46 = vadd.f32 %v821_v42, %v820_v40 }
 0x100   : > { %642 = vst [vmem:[%s1067_s8] sm:$0xff] %v626_v43  ;;  %650 = vst [vmem:[%s1067_s8 + $0x40] sm:$0xff] %v634_v44  ;;  %v627_v47 = vadd.f32 %v798_v45, %v1060_v35  ;;  %v635_v48 = vadd.f32 %v822_v46, %v1060_v35 }
 0x102   : > { %643 = vst [vmem:[%s1067_s8 + $0x8] sm:$0xff] %v627_v47  ;;  %651 = vst [vmem:[%s1067_s8 + $0x48] sm:$0xff] %v635_v48  ;;  %v799_v49 = vpop.f32.mrb[4].mxu0  ;;  %v823_v50 = vpop.f32.mrb[4].mxu1 }
 0x103   : > { %v800_v51 = vpop.f32.mrb[5].mxu0  ;;  %v824_v52 = vpop.f32.mrb[5].mxu1 }
 0x104   : > { %v801_v53 = vadd.f32 %v800_v51, %v799_v49  ;;  %v825_v54 = vadd.f32 %v824_v52, %v823_v50  ;;  %v802_v55 = vpop.f32.mrb[6].mxu0  ;;  %v826_v56 = vpop.f32.mrb[6].mxu1 }
 0x105   : > { %v803_v57 = vpop.f32.mrb[7].mxu0  ;;  %v827_v58 = vpop.f32.mrb[7].mxu1 }
 0x106   : > { %v628_v59 = vadd.f32 %v801_v53, %v1060_v35  ;;  %v636_v60 = vadd.f32 %v825_v54, %v1060_v35  ;;  %v804_v61 = vadd.f32 %v803_v57, %v802_v55  ;;  %v828_v62 = vadd.f32 %v827_v58, %v826_v56 }
 0x108   : > { %644 = vst [vmem:[%s1067_s8 + $0x10] sm:$0xff] %v628_v59  ;;  %652 = vst [vmem:[%s1067_s8 + $0x50] sm:$0xff] %v636_v60  ;;  %v629_v63 = vadd.f32 %v804_v61, %v1060_v35  ;;  %v637_v0 = vadd.f32 %v828_v62, %v1060_v35 }
 0x10a   : > { %645 = vst [vmem:[%s1067_s8 + $0x18] sm:$0xff] %v629_v63  ;;  %653 = vst [vmem:[%s1067_s8 + $0x58] sm:$0xff] %v637_v0  ;;  %v805_v1 = vpop.f32.mrb[8].mxu0  ;;  %v829_v2 = vpop.f32.mrb[8].mxu1 }
 0x10b   : > { %v806_v3 = vpop.f32.mrb[9].mxu0  ;;  %v830_v4 = vpop.f32.mrb[9].mxu1 }
 0x10c   : > { %v807_v5 = vadd.f32 %v806_v3, %v805_v1  ;;  %v831_v6 = vadd.f32 %v830_v4, %v829_v2  ;;  %v808_v7 = vpop.f32.mrb[10].mxu0  ;;  %v832_v8 = vpop.f32.mrb[10].mxu1 }
 0x10d   : > { %v809_v9 = vpop.f32.mrb[11].mxu0  ;;  %v833_v10 = vpop.f32.mrb[11].mxu1 }
 0x10e   : > { %v630_v11 = vadd.f32 %v807_v5, %v1060_v35  ;;  %v638_v12 = vadd.f32 %v831_v6, %v1060_v35  ;;  %v810_v13 = vadd.f32 %v809_v9, %v808_v7  ;;  %v834_v14 = vadd.f32 %v833_v10, %v832_v8 }
 0x110   : > { %646 = vst [vmem:[%s1067_s8 + $0x20] sm:$0xff] %v630_v11  ;;  %654 = vst [vmem:[%s1067_s8 + $0x60] sm:$0xff] %v638_v12  ;;  %v631_v15 = vadd.f32 %v810_v13, %v1060_v35  ;;  %v639_v16 = vadd.f32 %v834_v14, %v1060_v35 }
 0x112   : > { %647 = vst [vmem:[%s1067_s8 + $0x28] sm:$0xff] %v631_v15  ;;  %655 = vst [vmem:[%s1067_s8 + $0x68] sm:$0xff] %v639_v16  ;;  %v811_v17 = vpop.f32.mrb[12].mxu0  ;;  %v835_v18 = vpop.f32.mrb[12].mxu1 }
 0x113   : > { %v812_v19 = vpop.f32.mrb[13].mxu0  ;;  %v836_v20 = vpop.f32.mrb[13].mxu1 }
 0x114   : > { %v813_v21 = vadd.f32 %v812_v19, %v811_v17  ;;  %v837_v22 = vadd.f32 %v836_v20, %v835_v18  ;;  %v814_v23 = vpop.f32.mrb[14].mxu0  ;;  %v838_v24 = vpop.f32.mrb[14].mxu1 }
 0x115   : > { %v815_v25 = vpop.f32.mrb[15].mxu0  ;;  %v839_v26 = vpop.f32.mrb[15].mxu1 }
 0x116   : > { %v632_v27 = vadd.f32 %v813_v21, %v1060_v35  ;;  %v640_v28 = vadd.f32 %v837_v22, %v1060_v35  ;;  %v816_v29 = vadd.f32 %v815_v25, %v814_v23  ;;  %v840_v30 = vadd.f32 %v839_v26, %v838_v24 }
 0x118   : > { %648 = vst [vmem:[%s1067_s8 + $0x30] sm:$0xff] %v632_v27  ;;  %656 = vst [vmem:[%s1067_s8 + $0x70] sm:$0xff] %v640_v28  ;;  %v633_v31 = vadd.f32 %v816_v29, %v1060_v35  ;;  %v641_v32 = vadd.f32 %v840_v30, %v1060_v35 }
 0x11a   : > { %649 = vst [vmem:[%s1067_s8 + $0x38] sm:$0xff] %v633_v31  ;;  %657 = vst [vmem:[%s1067_s8 + $0x78] sm:$0xff] %v641_v32 }
 0x11b PF: > { %s13_s14 = sadd.s32 1, %s943_s14   ;;  %s1114_s12 = smov %s939_s13 }
 0x11c   : > { %p10_p5 = scmp.ge.s32.totalorder %s13_s14, 4   ;;  %s1115_s13 = smov %s1117_s15 }
 0x11e   :  { %12 = sbr.rel (!%p10_p5) target bundleno = 2 (0x2), region = 71 }

// kernel: gcn_forward.3
= control target key start
LH: loop header
LB: loop body
LE: loop exit
PB: predicated region body
PF: predicated region fallthrough
CT: control target
= control target key end

     0   :  { %s1282_s15 = smov 0   ;;  %s1284_s16 = smov 0   ;;  %s1498_s0 = inlined_call_operand.vmem [shape: bf16[256,256], index: 0, kind: input, shape index: {}]   ;;  %s1499_s1 = inlined_call_operand.vmem [shape: bf16[256,128], index: 1, kind: input, shape index: {}]   ;;  %s1500_s2 = inlined_call_operand.vmem [shape: bf16[128,256], index: 2, kind: input, shape index: {}]   ;;  %s1501_s3 = inlined_call_operand.vmem [shape: f32[1,256], index: 3, kind: input, shape index: {}]   ;;  %s1502_s4 = inlined_call_operand.vmem [shape: bf16[256,256], index: 4, kind: output, shape index: {}]  }
   0x1   :  { %s1286_s17 = smov 0  }
   0x2 LB: > { %s26_s18 = sadd.s32 1, %s1250_s16  ;;  %p1020_p0 = scmp.ge.s32.totalorder %s1254_s17, 1  ;;  %s1254_s17 = sphi %s1286_s17, %s14_s17   ;;  %s1250_s16 = sphi %s1284_s16, %s1504_s16   ;;  %s1246_s15 = sphi %s1282_s15, %s1503_s15  }
   0x3   : > { %p28_p1 = scmp.ge.s32.totalorder %s26_s18, 2  ;;  %p183_p2 = scmp.lt.s32.totalorder %s1254_s17, 3 }
   0x5   : > { %s1506_s18 = smov (%p28_p1, %s26_s18), 0  ;;  %p184_p3 = pnand %p1020_p0, %p183_p2 }
   0x6   : > { %v1168_v0 = vld [vmem:[%s1499_s1 + $0x40] sm:$0xff] (!%p184_p3)   ;;  %s1021_s21 = sshll.u32 (!%p184_p3), %s1246_s15, 4  ;;  %v1170_v2 = vld [vmem:[%s1499_s1 + $0x48] sm:$0xff] (!%p184_p3)   ;;  %v1172_v4 = vld [vmem:[%s1499_s1 + $0x50] sm:$0xff] (!%p184_p3)   ;;  %v1256_v48 = vmov (!%p184_p3), 0  }
   0x7   : > { %187 = sbr.rel (%p184_p3) target bundleno = 536 (0x218), region = 36  ;;  %v1169_v1 = vld [vmem:[%s1499_s1] sm:$0xff] (!%p184_p3)   ;;  %1079 = vmatprep.subr.bf16.mxu0 (!%p184_p3), %v1168_v0  ;;  %v1171_v3 = vld [vmem:[%s1499_s1 + $0x8] sm:$0xff] (!%p184_p3)   ;;  %p217_p4 = scmp.lt.s32.totalorder (!%p184_p3), %s1021_s21, 31  ;;  %v1173_v5 = vld [vmem:[%s1499_s1 + $0x10] sm:$0xff] (!%p184_p3)   ;;  %796 = vmatprep.mubr.bf16.mxu1 (!%p184_p3), %v1256_v48 }
   0x8   : > { %1080 = vmatpush3.bf16.msra.mxu0 (!%p184_p3), %v1169_v1  ;;  %v1174_v6 = vld [vmem:[%s1499_s1 + $0x58] sm:$0xff] (!%p184_p3)   ;;  %v1176_v8 = vld [vmem:[%s1499_s1 + $0x60] sm:$0xff] (!%p184_p3)   ;;  %v1178_v10 = vld [vmem:[%s1499_s1 + $0x68] sm:$0xff] (!%p184_p3)  }
   0x9   : > { %1081 = vmatprep.subr.bf16.mxu0 (!%p184_p3), %v1170_v2  ;;  %v1175_v7 = vld [vmem:[%s1499_s1 + $0x18] sm:$0xff] (!%p184_p3)   ;;  %v1177_v9 = vld [vmem:[%s1499_s1 + $0x20] sm:$0xff] (!%p184_p3)   ;;  %v1179_v12 = vld [vmem:[%s1499_s1 + $0x28] sm:$0xff] (!%p184_p3)  }
   0xa   : > { %v1180_v13 = vld [vmem:[%s1499_s1 + $0x70] sm:$0xff] (!%p184_p3)   ;;  %v1182_v15 = vld [vmem:[%s1499_s1 + $0x78] sm:$0xff] (!%p184_p3)   ;;  %v1208_v17 = vld [vmem:[%s1500_s2 + $0x4] ss:$8 sps:$4 sm:$0xff] (!%p184_p3)  }
   0xb   : > { %v1181_v14 = vld [vmem:[%s1499_s1 + $0x30] sm:$0xff] (!%p184_p3)   ;;  %v1183_v16 = vld [vmem:[%s1499_s1 + $0x38] sm:$0xff] (!%p184_p3)   ;;  %v1210_v18 = vld [vmem:[%s1500_s2] ss:$8 sps:$4 sm:$0xff] (!%p184_p3)   ;;  %764 = vmatprep.subr.bf16.mxu1 (!%p184_p3), %v1208_v17 }
   0xc   : > { %1082 = vmatpush3.bf16.msra.mxu0 (!%p184_p3), %v1171_v3  ;;  %v1211_v19 = vld [vmem:[%s1500_s2 + $0x14] ss:$8 sps:$4 sm:$0xff] (!%p184_p3)   ;;  %765 = vmatpush1.bf16.msra.mxu1 (!%p184_p3), %v1210_v18  ;;  %v1213_v21 = vld [vmem:[%s1500_s2 + $0x10] ss:$8 sps:$4 sm:$0xff] (!%p184_p3)   ;;  %v1214_v23 = vld [vmem:[%s1500_s2 + $0x24] ss:$8 sps:$4 sm:$0xff] (!%p184_p3)  }
   0xd   : > { %1083 = vmatprep.subr.bf16.mxu0 (!%p184_p3), %v1172_v4  ;;  %766 = vmatprep.subr.bf16.mxu1 (!%p184_p3), %v1211_v19  ;;  %v1216_v24 = vld [vmem:[%s1500_s2 + $0x20] ss:$8 sps:$4 sm:$0xff] (!%p184_p3)   ;;  %v1217_v25 = vld [vmem:[%s1500_s2 + $0x34] ss:$8 sps:$4 sm:$0xff] (!%p184_p3)   ;;  %v1219_v27 = vld [vmem:[%s1500_s2 + $0x30] ss:$8 sps:$4 sm:$0xff] (!%p184_p3)  }
   0xe   : > { %s1508_s21 = smov (!%p217_p4, %s1021_s21), 31  ;;  %v1220_v29 = vld [vmem:[%s1500_s2 + $0x44] ss:$8 sps:$4 sm:$0xff]   ;;  %v1222_v30 = vld [vmem:[%s1500_s2 + $0x40] ss:$8 sps:$4 sm:$0xff]  }
   0xf   : > { %s1077_s10 = sshll.u32 %s1508_s21, 3  ;;  %v1223_v31 = vld [vmem:[%s1500_s2 + $0x54] ss:$8 sps:$4 sm:$0xff]   ;;  %v1225_v33 = vld [vmem:[%s1500_s2 + $0x50] ss:$8 sps:$4 sm:$0xff]  }
  0x10   : > { %1084 = vmatpush3.bf16.msra.mxu0 %v1173_v5  ;;  %s1333_s19 = scalar_lea.vmem %s1498_s0, %s1077_s10  ;;  %767 = vmatpush1.bf16.msra.mxu1 %v1213_v21  ;;  %v1226_v44 = vld [vmem:[%s1500_s2 + $0x64] ss:$8 sps:$4 sm:$0xff]   ;;  %v1228_v45 = vld [vmem:[%s1500_s2 + $0x60] ss:$8 sps:$4 sm:$0xff]   ;;  %v1229_v46 = vld [vmem:[%s1500_s2 + $0x74] ss:$8 sps:$4 sm:$0xff]  }
  0x11   : > { %1085 = vmatprep.subr.bf16.mxu0 %v1174_v6  ;;  %v1186_v11 = vld [vmem:[%s1333_s19 + $0x4] ss:$8 sps:$4 sm:$0xff]   ;;  %v1184_v20 = vld [vmem:[%s1333_s19] ss:$8 sps:$4 sm:$0xff]   ;;  %v1187_v22 = vld [vmem:[%s1333_s19 + $0x14] ss:$8 sps:$4 sm:$0xff]   ;;  %768 = vmatprep.subr.bf16.mxu1 %v1214_v23 }
  0x12   : > { %532 = vmatprep.mubr.bf16.mxu0 %v1186_v11  ;;  %v1189_v26 = vld [vmem:[%s1333_s19 + $0x10] ss:$8 sps:$4 sm:$0xff]   ;;  %v1190_v28 = vld [vmem:[%s1333_s19 + $0x24] ss:$8 sps:$4 sm:$0xff]   ;;  %v1192_v32 = vld [vmem:[%s1333_s19 + $0x20] ss:$8 sps:$4 sm:$0xff]  }
  0x13   : > { %v1193_v34 = vld [vmem:[%s1333_s19 + $0x34] ss:$8 sps:$4 sm:$0xff]   ;;  %v1195_v35 = vld [vmem:[%s1333_s19 + $0x30] ss:$8 sps:$4 sm:$0xff]   ;;  %v1196_v36 = vld [vmem:[%s1333_s19 + $0x44] ss:$8 sps:$4 sm:$0xff]  }
  0x14   : > { %1086 = vmatpush3.bf16.msra.mxu0 %v1175_v7  ;;  %769 = vmatpush1.bf16.msra.mxu1 %v1216_v24  ;;  %v1198_v37 = vld [vmem:[%s1333_s19 + $0x40] ss:$8 sps:$4 sm:$0xff]   ;;  %v1199_v38 = vld [vmem:[%s1333_s19 + $0x54] ss:$8 sps:$4 sm:$0xff]   ;;  %v1201_v39 = vld [vmem:[%s1333_s19 + $0x50] ss:$8 sps:$4 sm:$0xff]  }
  0x15   : > { %1087 = vmatprep.subr.bf16.mxu0 %v1176_v8  ;;  %770 = vmatprep.subr.bf16.mxu1 %v1217_v25  ;;  %v1202_v40 = vld [vmem:[%s1333_s19 + $0x64] ss:$8 sps:$4 sm:$0xff]   ;;  %v1204_v41 = vld [vmem:[%s1333_s19 + $0x60] ss:$8 sps:$4 sm:$0xff]   ;;  %v1205_v42 = vld [vmem:[%s1333_s19 + $0x74] ss:$8 sps:$4 sm:$0xff]  }
  0x16   : > { %v1207_v43 = vld [vmem:[%s1333_s19 + $0x70] ss:$8 sps:$4 sm:$0xff]   ;;  %s1024_s19 = sshll.u32 %s1246_s15, 3 }
  0x17   : > { %v1231_v47 = vld [vmem:[%s1500_s2 + $0x70] ss:$8 sps:$4 sm:$0xff]   ;;  %p228_p5 = scmp.lt.s32.totalorder %s1024_s19, 15 }
  0x18   : > { %1088 = vmatpush3.bf16.msra.mxu0 %v1177_v9  ;;  %771 = vmatpush1.bf16.msra.mxu1 %v1219_v27 }
  0x19   : > { %1089 = vmatprep.subr.bf16.mxu0 %v1178_v10  ;;  %772 = vmatprep.subr.bf16.mxu1 %v1220_v29  ;;  %s1510_s19 = smov (!%p228_p5, %s1024_s19), 15 }
  0x1a   : > { %s1078_s15 = sshll.u32 %s1510_s19, 4 }
  0x1b   : > { %s1443_s28 = scalar_lea.vmem %s1502_s4, %s1078_s15 }
  0x1c   : > { %1090 = vmatpush3.bf16.msra.mxu0 %v1179_v12  ;;  %773 = vmatpush1.bf16.msra.mxu1 %v1222_v30 }
  0x1d   : > { %1091 = vmatprep.subr.bf16.mxu0 %v1180_v13  ;;  %774 = vmatprep.subr.bf16.mxu1 %v1223_v31 }
  0x20   : > { %1092 = vmatpush3.bf16.msra.mxu0 %v1181_v14  ;;  %775 = vmatpush1.bf16.msra.mxu1 %v1225_v33 }
  0x21   : > { %1093 = vmatprep.subr.bf16.mxu0 %v1182_v15  ;;  %776 = vmatprep.subr.bf16.mxu1 %v1226_v44  ;;  %v672_v44 = vld [vmem:[%s1501_s3] sm:$0x3] }
  0x24   : > { %1094 = vmatpush3.bf16.msra.mxu0 %v1183_v16  ;;  %777 = vmatpush1.bf16.msra.mxu1 %v1228_v45 }
  0x25   : > { %778 = vmatprep.subr.bf16.mxu1 %v1229_v46 }
  0x27   : > { %533 = vmatmul.mubr.bf16.vlgmr.msra.gmra.mrb[0].mxu0 %v1184_v20 }
  0x28   : > { %540 = vmatprep.mubr.bf16.mxu0 %v1187_v22  ;;  %779 = vmatpush1.bf16.msra.mxu1 %v1231_v47 }
  0x2f   : > { %541 = vmatmul.mubr.bf16.gmra.mrb[4].mxu0 %v1189_v26 }
  0x30   : > { %548 = vmatprep.mubr.bf16.mxu0 %v1190_v28 }
  0x37   : > { %549 = vmatmul.mubr.bf16.gmra.mrb[8].mxu0 %v1192_v32 }
  0x38   : > { %556 = vmatprep.mubr.bf16.mxu0 %v1193_v34 }
  0x3f   : > { %557 = vmatmul.mubr.bf16.gmra.mrb[12].mxu0 %v1195_v35 }
  0x40   : > { %564 = vmatprep.mubr.bf16.mxu0 %v1196_v36 }
  0x47   : > { %565 = vmatmul.mubr.bf16.gmra.mrb[16].mxu0 %v1198_v37 }
  0x48   : > { %572 = vmatprep.mubr.bf16.mxu0 %v1199_v38 }
  0x4f   : > { %573 = vmatmul.mubr.bf16.gmra.mrb[20].mxu0 %v1201_v39 }
  0x50   : > { %580 = vmatprep.mubr.bf16.mxu0 %v1202_v40 }
  0x57   : > { %581 = vmatmul.mubr.bf16.gmra.mrb[24].mxu0 %v1204_v41  ;;  %v674_v41 = vlaneseq }
  0x58   : > { %588 = vmatprep.mubr.bf16.mxu0 %v1205_v42 }
  0x59   : > { %v675_v42 = vshrl.u32 %v674_v41, 7 }
  0x5b   : > { %v680_v45 = vsub.s32 1, %v675_v42 }
  0x5d   : > { %v1434_v47 = vrot.slane %v672_v44, %v680_v45 }
  0x5f   : > { %589 = vmatmul.mubr.bf16.gmra.mrb[28].mxu0 %v1207_v43  ;;  %v676_v43 = vsub.s32 0, %v675_v42 }
  0x61   : > { %v1432_v46 = vrot.slane %v672_v44, %v676_v43 }
  0xfa   : > { %v1095_v49 = vpop.f32.mrb[0].mxu0 }
  0xfb   : > { %v1096_v50 = vpop.f32.mrb[1].mxu0 }
  0xfc   : > { %v1097_v51 = vadd.f32 %v1096_v50, %v1095_v49  ;;  %v1098_v52 = vpop.f32.mrb[2].mxu0 }
  0xfd   : > { %v1099_v53 = vpop.f32.mrb[3].mxu0 }
  0xfe   : > { %v1100_v54 = vadd.f32 %v1099_v53, %v1098_v52 }
 0x100   : > { %v648_v55 = vpack.c.bf16 %v1100_v54, %v1097_v51 }
 0x102   : > { %v1101_v56 = vpop.f32.mrb[4].mxu0  ;;  %797 = vmatmul.mubr.bf16.vlgmr.msra.gmra.mrb[0].mxu1 %v648_v55 }
 0x103   : > { %v1102_v57 = vpop.f32.mrb[5].mxu0  ;;  %806 = vmatprep.mubr.bf16.mxu1 %v1256_v48 }
 0x104   : > { %v1103_v58 = vadd.f32 %v1102_v57, %v1101_v56  ;;  %v1104_v59 = vpop.f32.mrb[6].mxu0 }
 0x105   : > { %v1105_v60 = vpop.f32.mrb[7].mxu0 }
 0x106   : > { %v1106_v61 = vadd.f32 %v1105_v60, %v1104_v59 }
 0x108   : > { %v649_v62 = vpack.c.bf16 %v1106_v61, %v1103_v58 }
 0x10a   : > { %v1107_v63 = vpop.f32.mrb[8].mxu0  ;;  %807 = vmatmul.mubr.bf16.gmra.mrb[4].mxu1 %v649_v62 }
 0x10b   : > { %v1108_v0 = vpop.f32.mrb[9].mxu0  ;;  %816 = vmatprep.mubr.bf16.mxu1 %v1256_v48 }
 0x10c   : > { %v1109_v1 = vadd.f32 %v1108_v0, %v1107_v63  ;;  %v1110_v2 = vpop.f32.mrb[10].mxu0 }
 0x10d   : > { %v1111_v3 = vpop.f32.mrb[11].mxu0 }
 0x10e   : > { %v1112_v4 = vadd.f32 %v1111_v3, %v1110_v2 }
 0x110   : > { %v650_v5 = vpack.c.bf16 %v1112_v4, %v1109_v1 }
 0x112   : > { %v1113_v6 = vpop.f32.mrb[12].mxu0  ;;  %817 = vmatmul.mubr.bf16.gmra.mrb[8].mxu1 %v650_v5 }
 0x113   : > { %v1114_v7 = vpop.f32.mrb[13].mxu0  ;;  %826 = vmatprep.mubr.bf16.mxu1 %v1256_v48 }
 0x114   : > { %v1115_v8 = vadd.f32 %v1114_v7, %v1113_v6  ;;  %v1116_v9 = vpop.f32.mrb[14].mxu0 }
 0x115   : > { %v1117_v10 = vpop.f32.mrb[15].mxu0 }
 0x116   : > { %v1118_v11 = vadd.f32 %v1117_v10, %v1116_v9 }
 0x118   : > { %v651_v12 = vpack.c.bf16 %v1118_v11, %v1115_v8 }
 0x11a   : > { %v1119_v13 = vpop.f32.mrb[16].mxu0  ;;  %827 = vmatmul.mubr.bf16.gmra.mrb[12].mxu1 %v651_v12 }
 0x11b   : > { %v1120_v14 = vpop.f32.mrb[17].mxu0  ;;  %836 = vmatprep.mubr.bf16.mxu1 %v1256_v48 }
 0x11c   : > { %v1121_v15 = vadd.f32 %v1120_v14, %v1119_v13  ;;  %v1122_v16 = vpop.f32.mrb[18].mxu0 }
 0x11d   : > { %v1123_v17 = vpop.f32.mrb[19].mxu0 }
 0x11e   : > { %v1124_v18 = vadd.f32 %v1123_v17, %v1122_v16 }
 0x120   : > { %v652_v19 = vpack.c.bf16 %v1124_v18, %v1121_v15 }
 0x122   : > { %v1125_v20 = vpop.f32.mrb[20].mxu0  ;;  %837 = vmatmul.mubr.bf16.gmra.mrb[16].mxu1 %v652_v19 }
 0x123   : > { %v1126_v21 = vpop.f32.mrb[21].mxu0  ;;  %846 = vmatprep.mubr.bf16.mxu1 %v1256_v48 }
 0x124   : > { %v1127_v22 = vadd.f32 %v1126_v21, %v1125_v20  ;;  %v1128_v23 = vpop.f32.mrb[22].mxu0 }
 0x125   : > { %v1129_v24 = vpop.f32.mrb[23].mxu0 }
 0x126   : > { %v1130_v25 = vadd.f32 %v1129_v24, %v1128_v23 }
 0x128   : > { %v653_v26 = vpack.c.bf16 %v1130_v25, %v1127_v22 }
 0x12a   : > { %v1131_v27 = vpop.f32.mrb[24].mxu0  ;;  %847 = vmatmul.mubr.bf16.gmra.mrb[20].mxu1 %v653_v26 }
 0x12b   : > { %v1132_v28 = vpop.f32.mrb[25].mxu0  ;;  %856 = vmatprep.mubr.bf16.mxu1 %v1256_v48 }
 0x12c   : > { %v1133_v29 = vadd.f32 %v1132_v28, %v1131_v27  ;;  %v1134_v30 = vpop.f32.mrb[26].mxu0 }
 0x12d   : > { %v1135_v31 = vpop.f32.mrb[27].mxu0 }
 0x12e   : > { %v1136_v32 = vadd.f32 %v1135_v31, %v1134_v30 }
 0x130   : > { %v654_v33 = vpack.c.bf16 %v1136_v32, %v1133_v29 }
 0x132   : > { %v1137_v34 = vpop.f32.mrb[28].mxu0  ;;  %857 = vmatmul.mubr.bf16.gmra.mrb[24].mxu1 %v654_v33 }
 0x133   : > { %v1138_v35 = vpop.f32.mrb[29].mxu0  ;;  %866 = vmatprep.mubr.bf16.mxu1 %v1256_v48 }
 0x134   : > { %v1139_v36 = vadd.f32 %v1138_v35, %v1137_v34  ;;  %v1140_v37 = vpop.f32.mrb[30].mxu0 }
 0x135   : > { %v1141_v38 = vpop.f32.mrb[31].mxu0 }
 0x136   : > { %v1142_v39 = vadd.f32 %v1141_v38, %v1140_v37 }
 0x138   : > { %v655_v40 = vpack.c.bf16 %v1142_v39, %v1139_v36 }
 0x13a   : > { %867 = vmatmul.mubr.bf16.gmra.mrb[28].mxu1 %v655_v40 }
 0x1d5   : > { %v798_v48 = vpop.f32.mrb[0].mxu1 }
 0x1d6   : > { %v799_v49 = vadd.f32 %v798_v48, %v1432_v46  ;;  %v800_v50 = vpop.f32.mrb[1].mxu1 }
 0x1d7   : > { %v801_v51 = vadd.f32 %v800_v50, %v1434_v47  ;;  %v802_v52 = vpop.f32.mrb[2].mxu1 }
 0x1d8   : > { %v803_v53 = vadd.f32 %v802_v52, %v1432_v46  ;;  %v804_v54 = vpop.f32.mrb[3].mxu1  ;;  %v877_v56 = vmax.f32 %v799_v49, 0.0 }
 0x1d9   : > { %v805_v55 = vadd.f32 %v804_v54, %v1434_v47  ;;  %v878_v58 = vmax.f32 %v801_v51, 0.0 }
 0x1da   : > { %v879_v57 = vmax.f32 %v803_v53, 0.0 }
 0x1db   : > { %v880_v59 = vmax.f32 %v805_v55, 0.0 }
 0x1dc   : > { %v909_v60 = vpack.c.bf16 %v879_v57, %v877_v56 }
 0x1dd   : > { %v910_v61 = vpack.c.bf16 %v880_v59, %v878_v58  ;;  %v808_v62 = vpop.f32.mrb[4].mxu1 }
 0x1de   : > { %925 = vst [vmem:[%s1443_s28] sm:$0xff] %v909_v60  ;;  %v809_v63 = vadd.f32 %v808_v62, %v1432_v46  ;;  %v810_v0 = vpop.f32.mrb[5].mxu1 }
 0x1df   : > { %926 = vst [vmem:[%s1443_s28 + $0x8] sm:$0xff] %v910_v61  ;;  %v811_v1 = vadd.f32 %v810_v0, %v1434_v47  ;;  %v812_v2 = vpop.f32.mrb[6].mxu1 }
 0x1e0   : > { %v813_v3 = vadd.f32 %v812_v2, %v1432_v46  ;;  %v814_v4 = vpop.f32.mrb[7].mxu1  ;;  %v881_v6 = vmax.f32 %v809_v63, 0.0 }
 0x1e1   : > { %v815_v5 = vadd.f32 %v814_v4, %v1434_v47  ;;  %v882_v8 = vmax.f32 %v811_v1, 0.0 }
 0x1e2   : > { %v883_v7 = vmax.f32 %v813_v3, 0.0 }
 0x1e3   : > { %v884_v9 = vmax.f32 %v815_v5, 0.0 }
 0x1e4   : > { %v911_v10 = vpack.c.bf16 %v883_v7, %v881_v6 }
 0x1e5   : > { %v912_v11 = vpack.c.bf16 %v884_v9, %v882_v8  ;;  %v818_v12 = vpop.f32.mrb[8].mxu1 }
 0x1e6   : > { %927 = vst [vmem:[%s1443_s28 + $0x10] sm:$0xff] %v911_v10  ;;  %v819_v13 = vadd.f32 %v818_v12, %v1432_v46  ;;  %v820_v14 = vpop.f32.mrb[9].mxu1 }
 0x1e7   : > { %928 = vst [vmem:[%s1443_s28 + $0x18] sm:$0xff] %v912_v11  ;;  %v821_v15 = vadd.f32 %v820_v14, %v1434_v47  ;;  %v822_v16 = vpop.f32.mrb[10].mxu1 }
 0x1e8   : > { %v823_v17 = vadd.f32 %v822_v16, %v1432_v46  ;;  %v824_v18 = vpop.f32.mrb[11].mxu1  ;;  %v885_v20 = vmax.f32 %v819_v13, 0.0 }
 0x1e9   : > { %v825_v19 = vadd.f32 %v824_v18, %v1434_v47  ;;  %v886_v22 = vmax.f32 %v821_v15, 0.0 }
 0x1ea   : > { %v887_v21 = vmax.f32 %v823_v17, 0.0 }
 0x1eb   : > { %v888_v23 = vmax.f32 %v825_v19, 0.0 }
 0x1ec   : > { %v913_v24 = vpack.c.bf16 %v887_v21, %v885_v20 }
 0x1ed   : > { %v914_v25 = vpack.c.bf16 %v888_v23, %v886_v22  ;;  %v828_v26 = vpop.f32.mrb[12].mxu1 }
 0x1ee   : > { %929 = vst [vmem:[%s1443_s28 + $0x20] sm:$0xff] %v913_v24  ;;  %v829_v27 = vadd.f32 %v828_v26, %v1432_v46  ;;  %v830_v28 = vpop.f32.mrb[13].mxu1 }
 0x1ef   : > { %930 = vst [vmem:[%s1443_s28 + $0x28] sm:$0xff] %v914_v25  ;;  %v831_v29 = vadd.f32 %v830_v28, %v1434_v47  ;;  %v832_v30 = vpop.f32.mrb[14].mxu1 }
 0x1f0   : > { %v833_v31 = vadd.f32 %v832_v30, %v1432_v46  ;;  %v834_v32 = vpop.f32.mrb[15].mxu1  ;;  %v889_v34 = vmax.f32 %v829_v27, 0.0 }
 0x1f1   : > { %v835_v33 = vadd.f32 %v834_v32, %v1434_v47  ;;  %v890_v36 = vmax.f32 %v831_v29, 0.0 }
 0x1f2   : > { %v891_v35 = vmax.f32 %v833_v31, 0.0 }
 0x1f3   : > { %v892_v37 = vmax.f32 %v835_v33, 0.0 }
 0x1f4   : > { %v915_v38 = vpack.c.bf16 %v891_v35, %v889_v34 }
 0x1f5   : > { %v916_v39 = vpack.c.bf16 %v892_v37, %v890_v36  ;;  %v838_v40 = vpop.f32.mrb[16].mxu1 }
 0x1f6   : > { %931 = vst [vmem:[%s1443_s28 + $0x30] sm:$0xff] %v915_v38  ;;  %v839_v41 = vadd.f32 %v838_v40, %v1432_v46  ;;  %v840_v42 = vpop.f32.mrb[17].mxu1 }
 0x1f7   : > { %932 = vst [vmem:[%s1443_s28 + $0x38] sm:$0xff] %v916_v39  ;;  %v841_v43 = vadd.f32 %v840_v42, %v1434_v47  ;;  %v842_v44 = vpop.f32.mrb[18].mxu1 }
 0x1f8   : > { %v843_v45 = vadd.f32 %v842_v44, %v1432_v46  ;;  %v844_v48 = vpop.f32.mrb[19].mxu1  ;;  %v893_v50 = vmax.f32 %v839_v41, 0.0 }
 0x1f9   : > { %v845_v49 = vadd.f32 %v844_v48, %v1434_v47  ;;  %v894_v52 = vmax.f32 %v841_v43, 0.0 }
 0x1fa   : > { %v895_v51 = vmax.f32 %v843_v45, 0.0 }
 0x1fb   : > { %v896_v53 = vmax.f32 %v845_v49, 0.0 }
 0x1fc   : > { %v917_v54 = vpack.c.bf16 %v895_v51, %v893_v50 }
 0x1fd   : > { %v918_v55 = vpack.c.bf16 %v896_v53, %v894_v52  ;;  %v848_v56 = vpop.f32.mrb[20].mxu1 }
 0x1fe   : > { %933 = vst [vmem:[%s1443_s28 + $0x40] sm:$0xff] %v917_v54  ;;  %v849_v57 = vadd.f32 %v848_v56, %v1432_v46  ;;  %v850_v58 = vpop.f32.mrb[21].mxu1 }
 0x1ff   : > { %934 = vst [vmem:[%s1443_s28 + $0x48] sm:$0xff] %v918_v55  ;;  %v851_v59 = vadd.f32 %v850_v58, %v1434_v47  ;;  %v852_v60 = vpop.f32.mrb[22].mxu1 }
 0x200   : > { %v853_v61 = vadd.f32 %v852_v60, %v1432_v46  ;;  %v854_v62 = vpop.f32.mrb[23].mxu1  ;;  %v897_v0 = vmax.f32 %v849_v57, 0.0 }
 0x201   : > { %v855_v63 = vadd.f32 %v854_v62, %v1434_v47  ;;  %v898_v2 = vmax.f32 %v851_v59, 0.0 }
 0x202   : > { %v899_v1 = vmax.f32 %v853_v61, 0.0 }
 0x203   : > { %v900_v3 = vmax.f32 %v855_v63, 0.0 }
 0x204   : > { %v919_v4 = vpack.c.bf16 %v899_v1, %v897_v0 }
 0x205   : > { %v920_v5 = vpack.c.bf16 %v900_v3, %v898_v2  ;;  %v858_v6 = vpop.f32.mrb[24].mxu1 }
 0x206   : > { %935 = vst [vmem:[%s1443_s28 + $0x50] sm:$0xff] %v919_v4  ;;  %v859_v7 = vadd.f32 %v858_v6, %v1432_v46  ;;  %v860_v8 = vpop.f32.mrb[25].mxu1 }
 0x207   : > { %936 = vst [vmem:[%s1443_s28 + $0x58] sm:$0xff] %v920_v5  ;;  %v861_v9 = vadd.f32 %v860_v8, %v1434_v47  ;;  %v862_v10 = vpop.f32.mrb[26].mxu1 }
 0x208   : > { %v863_v11 = vadd.f32 %v862_v10, %v1432_v46  ;;  %v864_v12 = vpop.f32.mrb[27].mxu1  ;;  %v901_v14 = vmax.f32 %v859_v7, 0.0 }
 0x209   : > { %v865_v13 = vadd.f32 %v864_v12, %v1434_v47  ;;  %v902_v16 = vmax.f32 %v861_v9, 0.0 }
 0x20a   : > { %v903_v15 = vmax.f32 %v863_v11, 0.0 }
 0x20b   : > { %v904_v17 = vmax.f32 %v865_v13, 0.0 }
 0x20c   : > { %v921_v18 = vpack.c.bf16 %v903_v15, %v901_v14 }
 0x20d   : > { %v922_v19 = vpack.c.bf16 %v904_v17, %v902_v16  ;;  %v868_v20 = vpop.f32.mrb[28].mxu1 }
 0x20e   : > { %937 = vst [vmem:[%s1443_s28 + $0x60] sm:$0xff] %v921_v18  ;;  %v869_v21 = vadd.f32 %v868_v20, %v1432_v46  ;;  %v870_v22 = vpop.f32.mrb[29].mxu1 }
 0x20f   : > { %938 = vst [vmem:[%s1443_s28 + $0x68] sm:$0xff] %v922_v19  ;;  %v871_v23 = vadd.f32 %v870_v22, %v1434_v47  ;;  %v872_v24 = vpop.f32.mrb[30].mxu1 }
 0x210   : > { %v873_v25 = vadd.f32 %v872_v24, %v1432_v46  ;;  %v874_v26 = vpop.f32.mrb[31].mxu1  ;;  %v905_v28 = vmax.f32 %v869_v21, 0.0 }
 0x211   : > { %v875_v27 = vadd.f32 %v874_v26, %v1434_v47  ;;  %v906_v30 = vmax.f32 %v871_v23, 0.0 }
 0x212   : > { %v907_v29 = vmax.f32 %v873_v25, 0.0 }
 0x213   : > { %v908_v31 = vmax.f32 %v875_v27, 0.0 }
 0x214   : > { %v923_v32 = vpack.c.bf16 %v907_v29, %v905_v28 }
 0x215   : > { %v924_v33 = vpack.c.bf16 %v908_v31, %v906_v30 }
 0x216   : > { %939 = vst [vmem:[%s1443_s28 + $0x70] sm:$0xff] %v923_v32 }
 0x217   : > { %940 = vst [vmem:[%s1443_s28 + $0x78] sm:$0xff] %v924_v33 }
 0x218 PF: > { %s14_s17 = sadd.s32 1, %s1254_s17   ;;  %s1503_s15 = smov %s1250_s16 }
 0x219   : > { %p11_p6 = scmp.ge.s32.totalorder %s14_s17, 4   ;;  %s1504_s16 = smov %s1506_s18 }
 0x21b   :  { %13 = sbr.rel (!%p11_p6) target bundleno = 2 (0x2), region = 75 }

// kernel: gcn_forward.4
= control target key start
LH: loop header
LB: loop body
LE: loop exit
PB: predicated region body
PF: predicated region fallthrough
CT: control target
= control target key end

     0   :  { %s1199_s12 = smov 0   ;;  %s1201_s13 = smov 0   ;;  %s1407_s0 = inlined_call_operand.vmem [shape: bf16[256,256], index: 0, kind: input, shape index: {}]   ;;  %s1408_s1 = inlined_call_operand.vmem [shape: bf16[256,256], index: 1, kind: input, shape index: {}]   ;;  %s1409_s2 = inlined_call_operand.vmem [shape: f32[1,256], index: 2, kind: input, shape index: {}]   ;;  %s1410_s3 = inlined_call_operand.vmem [shape: bf16[256,256], index: 3, kind: output, shape index: {}]  }
   0x1   :  { %s1203_s14 = smov 0  }
   0x2 LB: > { %s25_s15 = sadd.s32 1, %s1173_s13  ;;  %p968_p0 = scmp.ge.s32.totalorder %s1177_s14, 1  ;;  %s1177_s14 = sphi %s1203_s14, %s13_s14   ;;  %s1173_s13 = sphi %s1201_s13, %s1412_s13   ;;  %s1169_s12 = sphi %s1199_s12, %s1411_s12  }
   0x3   : > { %p27_p1 = scmp.ge.s32.totalorder %s25_s15, 2  ;;  %p158_p2 = scmp.lt.s32.totalorder %s1177_s14, 3 }
   0x5   : > { %s1414_s15 = smov (%p27_p1, %s25_s15), 0  ;;  %p159_p3 = pnand %p968_p0, %p158_p2 }
   0x6   : > { %v1083_v0 = vld [vmem:[%s1408_s1 + $0x4] ss:$8 sps:$4 sm:$0xff] (!%p159_p3)   ;;  %v1085_v1 = vld [vmem:[%s1408_s1] ss:$8 sps:$4 sm:$0xff] (!%p159_p3)   ;;  %v1086_v2 = vld [vmem:[%s1408_s1 + $0x14] ss:$8 sps:$4 sm:$0xff] (!%p159_p3)   ;;  %v783_v48 = vlaneseq (!%p159_p3) }
   0x7   : > { %162 = sbr.rel (%p159_p3) target bundleno = 317 (0x13d), region = 32  ;;  %569 = vmatprep.subr.bf16.mxu0 (!%p159_p3), %v1083_v0  ;;  %1027 = vmatprep.subr.bf16.mxu1 (!%p159_p3), %v1083_v0  ;;  %v1088_v3 = vld [vmem:[%s1408_s1 + $0x10] ss:$8 sps:$4 sm:$0xff] (!%p159_p3)   ;;  %v1089_v4 = vld [vmem:[%s1408_s1 + $0x24] ss:$8 sps:$4 sm:$0xff] (!%p159_p3)   ;;  %s969_s26 = sshll.u32 (!%p159_p3), %s1169_s12, 4 }
   0x8   : > { %570 = vmatpush1.bf16.msra.mxu0 (!%p159_p3), %v1085_v1  ;;  %1043 = vmatpush1.bf16.msra.mxu1 (!%p159_p3), %v1085_v1  ;;  %v1091_v5 = vld [vmem:[%s1408_s1 + $0x20] ss:$8 sps:$4 sm:$0xff] (!%p159_p3)   ;;  %v1092_v6 = vld [vmem:[%s1408_s1 + $0x34] ss:$8 sps:$4 sm:$0xff] (!%p159_p3)   ;;  %p190_p4 = scmp.lt.s32.totalorder (!%p159_p3), %s969_s26, 31  ;;  %v784_v49 = vshrl.u32 (!%p159_p3), %v783_v48, 7 }
   0x9   : > { %571 = vmatprep.subr.bf16.mxu0 (!%p159_p3), %v1086_v2  ;;  %1028 = vmatprep.subr.bf16.mxu1 (!%p159_p3), %v1086_v2  ;;  %v1094_v7 = vld [vmem:[%s1408_s1 + $0x30] ss:$8 sps:$4 sm:$0xff] (!%p159_p3)   ;;  %v1095_v8 = vld [vmem:[%s1408_s1 + $0x44] ss:$8 sps:$4 sm:$0xff] (!%p159_p3)   ;;  %v1097_v9 = vld [vmem:[%s1408_s1 + $0x40] ss:$8 sps:$4 sm:$0xff] (!%p159_p3)  }
   0xa   : > { %v1098_v10 = vld [vmem:[%s1408_s1 + $0x54] ss:$8 sps:$4 sm:$0xff] (!%p159_p3)   ;;  %v1100_v11 = vld [vmem:[%s1408_s1 + $0x50] ss:$8 sps:$4 sm:$0xff] (!%p159_p3)   ;;  %v1101_v12 = vld [vmem:[%s1408_s1 + $0x64] ss:$8 sps:$4 sm:$0xff] (!%p159_p3)  }
   0xb   : > { %v1103_v14 = vld [vmem:[%s1408_s1 + $0x60] ss:$8 sps:$4 sm:$0xff] (!%p159_p3)   ;;  %v1104_v16 = vld [vmem:[%s1408_s1 + $0x74] ss:$8 sps:$4 sm:$0xff] (!%p159_p3)   ;;  %v1106_v17 = vld [vmem:[%s1408_s1 + $0x70] ss:$8 sps:$4 sm:$0xff] (!%p159_p3)  }
   0xc   : > { %572 = vmatpush1.bf16.msra.mxu0 (!%p159_p3), %v1088_v3  ;;  %1044 = vmatpush1.bf16.msra.mxu1 (!%p159_p3), %v1088_v3  ;;  %v1107_v18 = vld [vmem:[%s1408_s1 + $0x84] ss:$8 sps:$4 sm:$0xff] (!%p159_p3)   ;;  %v1109_v19 = vld [vmem:[%s1408_s1 + $0x80] ss:$8 sps:$4 sm:$0xff] (!%p159_p3)   ;;  %v1110_v20 = vld [vmem:[%s1408_s1 + $0x94] ss:$8 sps:$4 sm:$0xff] (!%p159_p3)  }
   0xd   : > { %573 = vmatprep.subr.bf16.mxu0 (!%p159_p3), %v1089_v4  ;;  %1029 = vmatprep.subr.bf16.mxu1 (!%p159_p3), %v1089_v4  ;;  %v1112_v21 = vld [vmem:[%s1408_s1 + $0x90] ss:$8 sps:$4 sm:$0xff] (!%p159_p3)   ;;  %v1113_v22 = vld [vmem:[%s1408_s1 + $0xa4] ss:$8 sps:$4 sm:$0xff] (!%p159_p3)   ;;  %v1115_v23 = vld [vmem:[%s1408_s1 + $0xa0] ss:$8 sps:$4 sm:$0xff] (!%p159_p3)  }
   0xe   : > { %s1416_s26 = smov (!%p190_p4, %s969_s26), 31  ;;  %v1116_v24 = vld [vmem:[%s1408_s1 + $0xb4] ss:$8 sps:$4 sm:$0xff]   ;;  %v1118_v25 = vld [vmem:[%s1408_s1 + $0xb0] ss:$8 sps:$4 sm:$0xff]   ;;  %s972_s17 = sshll.u32 %s1169_s12, 3 }
   0xf   : > { %s1025_s16 = sshll.u32 %s1416_s26, 3  ;;  %v1119_v26 = vld [vmem:[%s1408_s1 + $0xc4] ss:$8 sps:$4 sm:$0xff]   ;;  %v1121_v27 = vld [vmem:[%s1408_s1 + $0xc0] ss:$8 sps:$4 sm:$0xff]   ;;  %v785_v50 = vsub.s32 0, %v784_v49 }
  0x10   : > { %574 = vmatpush1.bf16.msra.mxu0 %v1091_v5  ;;  %1045 = vmatpush1.bf16.msra.mxu1 %v1091_v5  ;;  %s1259_s21 = scalar_lea.vmem %s1407_s0, %s1025_s16  ;;  %v1122_v28 = vld [vmem:[%s1408_s1 + $0xd4] ss:$8 sps:$4 sm:$0xff]   ;;  %v1124_v29 = vld [vmem:[%s1408_s1 + $0xd0] ss:$8 sps:$4 sm:$0xff]   ;;  %v1125_v30 = vld [vmem:[%s1408_s1 + $0xe4] ss:$8 sps:$4 sm:$0xff]  }
  0x11   : > { %575 = vmatprep.subr.bf16.mxu0 %v1092_v6  ;;  %1030 = vmatprep.subr.bf16.mxu1 %v1092_v6  ;;  %v1133_v13 = vld [vmem:[%s1259_s21 + $0x4] ss:$8 sps:$4 sm:$0xff]   ;;  %v1127_v31 = vld [vmem:[%s1408_s1 + $0xe0] ss:$8 sps:$4 sm:$0xff]   ;;  %v1128_v32 = vld [vmem:[%s1408_s1 + $0xf4] ss:$8 sps:$4 sm:$0xff]  }
  0x12   : > { %v1136_v15 = vld [vmem:[%s1259_s21 + $0x44] ss:$8 sps:$4 sm:$0xff]   ;;  %601 = vmatprep.mubr.bf16.mxu0 %v1133_v13  ;;  %v1130_v33 = vld [vmem:[%s1408_s1 + $0xf0] ss:$8 sps:$4 sm:$0xff]   ;;  %v1131_v34 = vld [vmem:[%s1259_s21] ss:$8 sps:$4 sm:$0xff]  }
  0x13   : > { %641 = vmatprep.mubr.bf16.mxu1 %v1136_v15  ;;  %v1134_v35 = vld [vmem:[%s1259_s21 + $0x40] ss:$8 sps:$4 sm:$0xff]   ;;  %v1137_v36 = vld [vmem:[%s1259_s21 + $0x14] ss:$8 sps:$4 sm:$0xff]   ;;  %v1141_v38 = vld [vmem:[%s1259_s21 + $0x10] ss:$8 sps:$4 sm:$0xff]  }
  0x14   : > { %576 = vmatpush1.bf16.msra.mxu0 %v1094_v7  ;;  %1046 = vmatpush1.bf16.msra.mxu1 %v1094_v7  ;;  %v1139_v37 = vld [vmem:[%s1259_s21 + $0x54] ss:$8 sps:$4 sm:$0xff]   ;;  %v1142_v39 = vld [vmem:[%s1259_s21 + $0x50] ss:$8 sps:$4 sm:$0xff]   ;;  %v1143_v40 = vld [vmem:[%s1259_s21 + $0x24] ss:$8 sps:$4 sm:$0xff]  }
  0x15   : > { %577 = vmatprep.subr.bf16.mxu0 %v1095_v8  ;;  %1031 = vmatprep.subr.bf16.mxu1 %v1095_v8  ;;  %v1145_v41 = vld [vmem:[%s1259_s21 + $0x64] ss:$8 sps:$4 sm:$0xff]   ;;  %v1147_v42 = vld [vmem:[%s1259_s21 + $0x20] ss:$8 sps:$4 sm:$0xff]   ;;  %v1149_v44 = vld [vmem:[%s1259_s21 + $0x34] ss:$8 sps:$4 sm:$0xff]  }
  0x16   : > { %v1148_v43 = vld [vmem:[%s1259_s21 + $0x60] ss:$8 sps:$4 sm:$0xff]   ;;  %v1151_v45 = vld [vmem:[%s1259_s21 + $0x74] ss:$8 sps:$4 sm:$0xff]   ;;  %v1153_v46 = vld [vmem:[%s1259_s21 + $0x30] ss:$8 sps:$4 sm:$0xff]  }
  0x17   : > { %v1154_v47 = vld [vmem:[%s1259_s21 + $0x70] ss:$8 sps:$4 sm:$0xff]   ;;  %v781_v51 = vld [vmem:[%s1409_s2] sm:$0x3]  ;;  %v789_v52 = vsub.s32 1, %v784_v49  ;;  %p201_p5 = scmp.lt.s32.totalorder %s972_s17, 15 }
  0x18   : > { %578 = vmatpush1.bf16.msra.mxu0 %v1097_v9  ;;  %1047 = vmatpush1.bf16.msra.mxu1 %v1097_v9  ;;  %v1341_v53 = vrot.slane %v781_v51, %v785_v50 }
  0x19   : > { %579 = vmatprep.subr.bf16.mxu0 %v1098_v10  ;;  %1032 = vmatprep.subr.bf16.mxu1 %v1098_v10  ;;  %v1343_v54 = vrot.slane %v781_v51, %v789_v52  ;;  %s1418_s17 = smov (!%p201_p5, %s972_s17), 15 }
  0x1a   : > { %s1026_s12 = sshll.u32 %s1418_s17, 4 }
  0x1b   : > { %s1356_s22 = scalar_lea.vmem %s1410_s3, %s1026_s12 }
  0x1c   : > { %580 = vmatpush1.bf16.msra.mxu0 %v1100_v11  ;;  %1048 = vmatpush1.bf16.msra.mxu1 %v1100_v11 }
  0x1d   : > { %581 = vmatprep.subr.bf16.mxu0 %v1101_v12  ;;  %1033 = vmatprep.subr.bf16.mxu1 %v1101_v12 }
  0x20   : > { %582 = vmatpush1.bf16.msra.mxu0 %v1103_v14  ;;  %1049 = vmatpush1.bf16.msra.mxu1 %v1103_v14 }
  0x21   : > { %583 = vmatprep.subr.bf16.mxu0 %v1104_v16  ;;  %1034 = vmatprep.subr.bf16.mxu1 %v1104_v16 }
  0x24   : > { %584 = vmatpush1.bf16.msra.mxu0 %v1106_v17  ;;  %1050 = vmatpush1.bf16.msra.mxu1 %v1106_v17 }
  0x25   : > { %585 = vmatprep.subr.bf16.mxu0 %v1107_v18  ;;  %1035 = vmatprep.subr.bf16.mxu1 %v1107_v18 }
  0x28   : > { %586 = vmatpush1.bf16.msra.mxu0 %v1109_v19  ;;  %1051 = vmatpush1.bf16.msra.mxu1 %v1109_v19 }
  0x29   : > { %587 = vmatprep.subr.bf16.mxu0 %v1110_v20  ;;  %1036 = vmatprep.subr.bf16.mxu1 %v1110_v20 }
  0x2c   : > { %588 = vmatpush1.bf16.msra.mxu0 %v1112_v21  ;;  %1052 = vmatpush1.bf16.msra.mxu1 %v1112_v21 }
  0x2d   : > { %589 = vmatprep.subr.bf16.mxu0 %v1113_v22  ;;  %1037 = vmatprep.subr.bf16.mxu1 %v1113_v22 }
  0x30   : > { %590 = vmatpush1.bf16.msra.mxu0 %v1115_v23  ;;  %1053 = vmatpush1.bf16.msra.mxu1 %v1115_v23 }
  0x31   : > { %591 = vmatprep.subr.bf16.mxu0 %v1116_v24  ;;  %1038 = vmatprep.subr.bf16.mxu1 %v1116_v24 }
  0x34   : > { %592 = vmatpush1.bf16.msra.mxu0 %v1118_v25  ;;  %1054 = vmatpush1.bf16.msra.mxu1 %v1118_v25 }
  0x35   : > { %593 = vmatprep.subr.bf16.mxu0 %v1119_v26  ;;  %1039 = vmatprep.subr.bf16.mxu1 %v1119_v26 }
  0x38   : > { %594 = vmatpush1.bf16.msra.mxu0 %v1121_v27  ;;  %1055 = vmatpush1.bf16.msra.mxu1 %v1121_v27 }
  0x39   : > { %595 = vmatprep.subr.bf16.mxu0 %v1122_v28  ;;  %1040 = vmatprep.subr.bf16.mxu1 %v1122_v28 }
  0x3c   : > { %596 = vmatpush1.bf16.msra.mxu0 %v1124_v29  ;;  %1056 = vmatpush1.bf16.msra.mxu1 %v1124_v29 }
  0x3d   : > { %597 = vmatprep.subr.bf16.mxu0 %v1125_v30  ;;  %1041 = vmatprep.subr.bf16.mxu1 %v1125_v30 }
  0x40   : > { %598 = vmatpush1.bf16.msra.mxu0 %v1127_v31  ;;  %1057 = vmatpush1.bf16.msra.mxu1 %v1127_v31 }
  0x41   : > { %599 = vmatprep.subr.bf16.mxu0 %v1128_v32  ;;  %1042 = vmatprep.subr.bf16.mxu1 %v1128_v32 }
  0x44   : > { %600 = vmatpush1.bf16.msra.mxu0 %v1130_v33  ;;  %1058 = vmatpush1.bf16.msra.mxu1 %v1130_v33 }
  0x47   : > { %602 = vmatmul.mubr.bf16.vlgmr.msra.gmra.mrb[0].mxu0 %v1131_v34  ;;  %642 = vmatmul.mubr.bf16.vlgmr.msra.gmra.mrb[0].mxu1 %v1134_v35 }
  0x48   : > { %611 = vmatprep.mubr.bf16.mxu0 %v1137_v36  ;;  %651 = vmatprep.mubr.bf16.mxu1 %v1139_v37 }
  0x4f   : > { %612 = vmatmul.mubr.bf16.gmra.mrb[4].mxu0 %v1141_v38  ;;  %652 = vmatmul.mubr.bf16.gmra.mrb[4].mxu1 %v1142_v39 }
  0x50   : > { %621 = vmatprep.mubr.bf16.mxu0 %v1143_v40  ;;  %661 = vmatprep.mubr.bf16.mxu1 %v1145_v41 }
  0x57   : > { %622 = vmatmul.mubr.bf16.gmra.mrb[8].mxu0 %v1147_v42  ;;  %662 = vmatmul.mubr.bf16.gmra.mrb[8].mxu1 %v1148_v43 }
  0x58   : > { %631 = vmatprep.mubr.bf16.mxu0 %v1149_v44  ;;  %671 = vmatprep.mubr.bf16.mxu1 %v1151_v45 }
  0x5f   : > { %632 = vmatmul.mubr.bf16.gmra.mrb[12].mxu0 %v1153_v46  ;;  %672 = vmatmul.mubr.bf16.gmra.mrb[12].mxu1 %v1154_v47 }
 0x11a   : > { %v603_v55 = vpop.f32.mrb[0].mxu0  ;;  %v643_v56 = vpop.f32.mrb[0].mxu1 }
 0x11b   : > { %v793_v57 = vadd.f32 %v1341_v53, %v603_v55  ;;  %v809_v58 = vadd.f32 %v1341_v53, %v643_v56  ;;  %v605_v59 = vpop.f32.mrb[1].mxu0  ;;  %v645_v60 = vpop.f32.mrb[1].mxu1 }
 0x11c   : > { %v794_v61 = vadd.f32 %v1343_v54, %v605_v59  ;;  %v810_v62 = vadd.f32 %v1343_v54, %v645_v60  ;;  %v607_v63 = vpop.f32.mrb[2].mxu0  ;;  %v647_v0 = vpop.f32.mrb[2].mxu1 }
 0x11d   : > { %v795_v1 = vadd.f32 %v1341_v53, %v607_v63  ;;  %v811_v2 = vadd.f32 %v1341_v53, %v647_v0  ;;  %v609_v3 = vpop.f32.mrb[3].mxu0  ;;  %v649_v4 = vpop.f32.mrb[3].mxu1  ;;  %v825_v7 = vmax.f32 %v793_v57, 0.0  ;;  %v841_v8 = vmax.f32 %v809_v58, 0.0 }
 0x11e   : > { %v796_v5 = vadd.f32 %v1343_v54, %v609_v3  ;;  %v812_v6 = vadd.f32 %v1343_v54, %v649_v4  ;;  %v826_v11 = vmax.f32 %v794_v61, 0.0  ;;  %v842_v12 = vmax.f32 %v810_v62, 0.0 }
 0x11f   : > { %v827_v9 = vmax.f32 %v795_v1, 0.0  ;;  %v843_v10 = vmax.f32 %v811_v2, 0.0 }
 0x120   : > { %v828_v13 = vmax.f32 %v796_v5, 0.0  ;;  %v844_v14 = vmax.f32 %v812_v6, 0.0 }
 0x121   : > { %v857_v15 = vpack.c.bf16 %v827_v9, %v825_v7  ;;  %v865_v16 = vpack.c.bf16 %v843_v10, %v841_v8 }
 0x122   : > { %v858_v17 = vpack.c.bf16 %v828_v13, %v826_v11  ;;  %v866_v18 = vpack.c.bf16 %v844_v14, %v842_v12  ;;  %v613_v19 = vpop.f32.mrb[4].mxu0  ;;  %v653_v20 = vpop.f32.mrb[4].mxu1 }
 0x123   : > { %873 = vst [vmem:[%s1356_s22] sm:$0xff] %v857_v15  ;;  %881 = vst [vmem:[%s1356_s22 + $0x40] sm:$0xff] %v865_v16  ;;  %v797_v21 = vadd.f32 %v1341_v53, %v613_v19  ;;  %v813_v22 = vadd.f32 %v1341_v53, %v653_v20  ;;  %v615_v23 = vpop.f32.mrb[5].mxu0  ;;  %v655_v24 = vpop.f32.mrb[5].mxu1 }
 0x124   : > { %874 = vst [vmem:[%s1356_s22 + $0x8] sm:$0xff] %v858_v17  ;;  %882 = vst [vmem:[%s1356_s22 + $0x48] sm:$0xff] %v866_v18  ;;  %v798_v25 = vadd.f32 %v1343_v54, %v615_v23  ;;  %v814_v26 = vadd.f32 %v1343_v54, %v655_v24  ;;  %v617_v27 = vpop.f32.mrb[6].mxu0  ;;  %v657_v28 = vpop.f32.mrb[6].mxu1 }
 0x125   : > { %v799_v29 = vadd.f32 %v1341_v53, %v617_v27  ;;  %v815_v30 = vadd.f32 %v1341_v53, %v657_v28  ;;  %v619_v31 = vpop.f32.mrb[7].mxu0  ;;  %v659_v32 = vpop.f32.mrb[7].mxu1  ;;  %v829_v35 = vmax.f32 %v797_v21, 0.0  ;;  %v845_v36 = vmax.f32 %v813_v22, 0.0 }
 0x126   : > { %v800_v33 = vadd.f32 %v1343_v54, %v619_v31  ;;  %v816_v34 = vadd.f32 %v1343_v54, %v659_v32  ;;  %v830_v39 = vmax.f32 %v798_v25, 0.0  ;;  %v846_v40 = vmax.f32 %v814_v26, 0.0 }
 0x127   : > { %v831_v37 = vmax.f32 %v799_v29, 0.0  ;;  %v847_v38 = vmax.f32 %v815_v30, 0.0 }
 0x128   : > { %v832_v41 = vmax.f32 %v800_v33, 0.0  ;;  %v848_v42 = vmax.f32 %v816_v34, 0.0 }
 0x129   : > { %v859_v43 = vpack.c.bf16 %v831_v37, %v829_v35  ;;  %v867_v44 = vpack.c.bf16 %v847_v38, %v845_v36 }
 0x12a   : > { %v860_v45 = vpack.c.bf16 %v832_v41, %v830_v39  ;;  %v868_v46 = vpack.c.bf16 %v848_v42, %v846_v40  ;;  %v623_v47 = vpop.f32.mrb[8].mxu0  ;;  %v663_v48 = vpop.f32.mrb[8].mxu1 }
 0x12b   : > { %875 = vst [vmem:[%s1356_s22 + $0x10] sm:$0xff] %v859_v43  ;;  %883 = vst [vmem:[%s1356_s22 + $0x50] sm:$0xff] %v867_v44  ;;  %v801_v49 = vadd.f32 %v1341_v53, %v623_v47  ;;  %v817_v50 = vadd.f32 %v1341_v53, %v663_v48  ;;  %v625_v51 = vpop.f32.mrb[9].mxu0  ;;  %v665_v52 = vpop.f32.mrb[9].mxu1 }
 0x12c   : > { %876 = vst [vmem:[%s1356_s22 + $0x18] sm:$0xff] %v860_v45  ;;  %884 = vst [vmem:[%s1356_s22 + $0x58] sm:$0xff] %v868_v46  ;;  %v802_v55 = vadd.f32 %v1343_v54, %v625_v51  ;;  %v818_v56 = vadd.f32 %v1343_v54, %v665_v52  ;;  %v627_v57 = vpop.f32.mrb[10].mxu0  ;;  %v667_v58 = vpop.f32.mrb[10].mxu1 }
 0x12d   : > { %v803_v59 = vadd.f32 %v1341_v53, %v627_v57  ;;  %v819_v60 = vadd.f32 %v1341_v53, %v667_v58  ;;  %v629_v61 = vpop.f32.mrb[11].mxu0  ;;  %v669_v62 = vpop.f32.mrb[11].mxu1  ;;  %v833_v1 = vmax.f32 %v801_v49, 0.0  ;;  %v849_v2 = vmax.f32 %v817_v50, 0.0 }
 0x12e   : > { %v804_v63 = vadd.f32 %v1343_v54, %v629_v61  ;;  %v820_v0 = vadd.f32 %v1343_v54, %v669_v62  ;;  %v834_v5 = vmax.f32 %v802_v55, 0.0  ;;  %v850_v6 = vmax.f32 %v818_v56, 0.0 }
 0x12f   : > { %v835_v3 = vmax.f32 %v803_v59, 0.0  ;;  %v851_v4 = vmax.f32 %v819_v60, 0.0 }
 0x130   : > { %v836_v7 = vmax.f32 %v804_v63, 0.0  ;;  %v852_v8 = vmax.f32 %v820_v0, 0.0 }
 0x131   : > { %v861_v9 = vpack.c.bf16 %v835_v3, %v833_v1  ;;  %v869_v10 = vpack.c.bf16 %v851_v4, %v849_v2 }
 0x132   : > { %v862_v11 = vpack.c.bf16 %v836_v7, %v834_v5  ;;  %v870_v12 = vpack.c.bf16 %v852_v8, %v850_v6  ;;  %v633_v13 = vpop.f32.mrb[12].mxu0  ;;  %v673_v14 = vpop.f32.mrb[12].mxu1 }
 0x133   : > { %877 = vst [vmem:[%s1356_s22 + $0x20] sm:$0xff] %v861_v9  ;;  %885 = vst [vmem:[%s1356_s22 + $0x60] sm:$0xff] %v869_v10  ;;  %v805_v15 = vadd.f32 %v1341_v53, %v633_v13  ;;  %v821_v16 = vadd.f32 %v1341_v53, %v673_v14  ;;  %v635_v17 = vpop.f32.mrb[13].mxu0  ;;  %v675_v18 = vpop.f32.mrb[13].mxu1 }
 0x134   : > { %878 = vst [vmem:[%s1356_s22 + $0x28] sm:$0xff] %v862_v11  ;;  %886 = vst [vmem:[%s1356_s22 + $0x68] sm:$0xff] %v870_v12  ;;  %v806_v19 = vadd.f32 %v1343_v54, %v635_v17  ;;  %v822_v20 = vadd.f32 %v1343_v54, %v675_v18  ;;  %v637_v21 = vpop.f32.mrb[14].mxu0  ;;  %v677_v22 = vpop.f32.mrb[14].mxu1 }
 0x135   : > { %v807_v23 = vadd.f32 %v1341_v53, %v637_v21  ;;  %v823_v24 = vadd.f32 %v1341_v53, %v677_v22  ;;  %v639_v25 = vpop.f32.mrb[15].mxu0  ;;  %v679_v26 = vpop.f32.mrb[15].mxu1  ;;  %v837_v29 = vmax.f32 %v805_v15, 0.0  ;;  %v853_v30 = vmax.f32 %v821_v16, 0.0 }
 0x136   : > { %v808_v27 = vadd.f32 %v1343_v54, %v639_v25  ;;  %v824_v28 = vadd.f32 %v1343_v54, %v679_v26  ;;  %v838_v33 = vmax.f32 %v806_v19, 0.0  ;;  %v854_v34 = vmax.f32 %v822_v20, 0.0 }
 0x137   : > { %v839_v31 = vmax.f32 %v807_v23, 0.0  ;;  %v855_v32 = vmax.f32 %v823_v24, 0.0 }
 0x138   : > { %v840_v35 = vmax.f32 %v808_v27, 0.0  ;;  %v856_v36 = vmax.f32 %v824_v28, 0.0 }
 0x139   : > { %v863_v37 = vpack.c.bf16 %v839_v31, %v837_v29  ;;  %v871_v53 = vpack.c.bf16 %v855_v32, %v853_v30 }
 0x13a   : > { %v864_v38 = vpack.c.bf16 %v840_v35, %v838_v33  ;;  %v872_v39 = vpack.c.bf16 %v856_v36, %v854_v34 }
 0x13b   : > { %879 = vst [vmem:[%s1356_s22 + $0x30] sm:$0xff] %v863_v37  ;;  %887 = vst [vmem:[%s1356_s22 + $0x70] sm:$0xff] %v871_v53 }
 0x13c   : > { %880 = vst [vmem:[%s1356_s22 + $0x38] sm:$0xff] %v864_v38  ;;  %888 = vst [vmem:[%s1356_s22 + $0x78] sm:$0xff] %v872_v39 }
 0x13d PF: > { %s13_s14 = sadd.s32 1, %s1177_s14   ;;  %s1411_s12 = smov %s1173_s13 }
 0x13e   : > { %p10_p6 = scmp.ge.s32.totalorder %s13_s14, 4   ;;  %s1412_s13 = smov %s1414_s15 }
 0x140   :  { %12 = sbr.rel (!%p10_p6) target bundleno = 2 (0x2), region = 71 }

</bundles_post_ra>
